<compile_context>
chip_gen: v5e
topology: v5e:2x2
jax: 0.10.0
libtpu: 0.0.40
codegen_flags: <defaults>
</compile_context>

<pallas_src>
import functools

import jax
import jax.numpy as jnp
from jax.experimental import pallas as pl
from jax.experimental.pallas import tpu as pltpu


def _softplus_beta100(z):
    # PyTorch Softplus(beta=100, threshold=20):
    #   if beta*z > threshold: z  else: (1/beta) * log(1 + exp(beta*z))
    bz = 100.0 * z
    safe = jnp.minimum(bz, 20.0)  # avoid overflow in exp on the linear branch
    return jnp.where(bz > 20.0, z, jnp.log1p(jnp.exp(safe)) * (1.0 / 100.0))


def _isdf_kernel(scale_output,                  # python float (literal)
                 xT_ref,                        # (E, tile_n)
                 w_in_ref, b_in_ref,            # (H, E), (H, 1)
                 w_m1_ref, b_m1_ref,            # (H, H), (H, 1)
                 w_ch_ref, w_ce_ref, b_c_ref,   # (H, H), (H, E), (H, 1)
                 w_m2_ref, b_m2_ref,            # (H, H), (H, 1)
                 w_o_ref, b_o_ref,              # (H, 1), (1, 1)
                 out_ref):                      # (1, tile_n)
    xT = xT_ref[...]  # (E, tile_n) f32, points on the lane axis

    # in_layer: fc1^T = sp(W_in @ x^T + b_in)
    fc1 = _softplus_beta100(
        jnp.dot(w_in_ref[...], xT, preferred_element_type=jnp.float32)
        + b_in_ref[...])
    # mid1 (hidden_layers_block = 1)
    fc2 = _softplus_beta100(
        jnp.dot(w_m1_ref[...], fc1, preferred_element_type=jnp.float32)
        + b_m1_ref[...])
    # cat_layer: concat(fc2, x) along features == Wc_h @ fc2^T + Wc_e @ x^T
    fc3 = _softplus_beta100(
        jnp.dot(w_ch_ref[...], fc2, preferred_element_type=jnp.float32)
        + jnp.dot(w_ce_ref[...], xT, preferred_element_type=jnp.float32)
        + b_c_ref[...])
    # mid2 (hidden_layers_block = 1)
    fc4 = _softplus_beta100(
        jnp.dot(w_m2_ref[...], fc3, preferred_element_type=jnp.float32)
        + b_m2_ref[...])
    # out_alpha (Linear H->1): broadcast-multiply + sublane reduce (VPU/XLU);
    # result stays lane-dense as a (1, tile_n) row.
    raw = jnp.sum(fc4 * w_o_ref[...], axis=0, keepdims=True) + b_o_ref[...]
    out_ref[...] = (raw * scale_output).astype(out_ref.dtype)


def _round_up(x, m):
    return ((x + m - 1) // m) * m


def isdf_map_forward(x_pe, params, *, scale_output=1.0, pe_mask=None,
                     noise_std=None, key=None, tile_n=2048):
    """Pallas implementation of IsdfMap.forward.

    x_pe: [..., E] float32 position-encoded points.
    Returns alpha with shape x_pe.shape[:-1].
    """
    if pe_mask is not None:
        x_pe = x_pe * pe_mask  # glue: optional elementwise mask, outside kernel

    lead_shape = x_pe.shape[:-1]
    E = x_pe.shape[-1]
    x2d = x_pe.reshape(-1, E).astype(jnp.float32)
    N = x2d.shape[0]

    # Point dimension goes on the lane axis: transpose to (E, N) and pad N up
    # to a multiple of the tile.  Tile is forced to a multiple of 128 and
    # shrinks automatically for small inputs.
    n_min = _round_up(max(N, 1), 128)
    tile_n = _round_up(max(128, min(int(tile_n), n_min)), 128)
    n_pad = _round_up(max(N, 1), tile_n)
    xT = x2d.T
    if n_pad != N:
        xT = jnp.pad(xT, ((0, 0), (0, n_pad - N)))

    (w_in, b_in, w_m1, b_m1, w_ch, w_ce, b_c, w_m2, b_m2, w_o, b_o) = params
    H = w_in.shape[0]   # weights stored [out, in]

    grid = (n_pad // tile_n,)
    full = lambda i: (0, 0)   # weights: constant block index -> stay resident

    kernel = functools.partial(_isdf_kernel, float(scale_output))

    raw = pl.pallas_call(
        kernel,
        out_shape=jax.ShapeDtypeStruct((1, n_pad), jnp.float32),
        grid_spec=pltpu.PrefetchScalarGridSpec(
            num_scalar_prefetch=0,
            grid=grid,
            in_specs=[
                pl.BlockSpec((E, tile_n), lambda i: (0, i)),   # x^T tile
                pl.BlockSpec((H, E), full),                    # w_in
                pl.BlockSpec((H, 1), full),                    # b_in
                pl.BlockSpec((H, H), full),                    # w_mid1
                pl.BlockSpec((H, 1), full),                    # b_mid1
                pl.BlockSpec((H, H), full),                    # w_cat (H part)
                pl.BlockSpec((H, E), full),                    # w_cat (E part)
                pl.BlockSpec((H, 1), full),                    # b_cat
                pl.BlockSpec((H, H), full),                    # w_mid2
                pl.BlockSpec((H, 1), full),                    # b_mid2
                pl.BlockSpec((H, 1), full),                    # w_out (column)
                pl.BlockSpec((1, 1), full),                    # b_out
            ],
            out_specs=pl.BlockSpec((1, tile_n), lambda i: (0, i)),
        ),
        compiler_params=pltpu.CompilerParams(
            # grid steps are independent -> shardable across TensorCores (v7x)
            dimension_semantics=("parallel",)),
    )(xT, w_in, b_in, w_m1, b_m1, w_ch, w_ce, b_c, w_m2, b_m2, w_o, b_o)

    alpha = raw[0, :N].reshape(lead_shape)

    if noise_std is not None:
        # TODO(synk): PyTorch draws torch.randn on device inside forward; here
        # noise is added in plain JAX (glue) to keep the kernel deterministic.
        noise = jax.random.normal(key, alpha.shape, dtype=alpha.dtype) * noise_std
        alpha = alpha + noise
    return alpha


def init_isdf_params(key, pos_enc_embedding_size, hidden_size):
    """Deterministic synthetic parameters (xavier-normal weights, small uniform
    biases), stored as [out, in] (PyTorch layout) with column biases."""
    E, H = pos_enc_embedding_size, hidden_size
    keys = jax.random.split(key, 12)

    def xavier(k, fan_out, fan_in):
        std = jnp.sqrt(2.0 / (fan_in + fan_out))
        return jax.random.normal(k, (fan_out, fan_in), jnp.float32) * std

    def bias(k, n):
        return jax.random.uniform(k, (n, 1), jnp.float32, -0.01, 0.01)

    w_in = xavier(keys[0], H, E)
    b_in = bias(keys[1], H)
    w_m1 = xavier(keys[2], H, H)
    b_m1 = bias(keys[3], H)
    # cat_layer has in_features = H + E; split into H-part and E-part.
    w_cat = xavier(keys[4], H, H + E)
    w_ch, w_ce = w_cat[:, :H], w_cat[:, H:]
    b_c = bias(keys[5], H)
    w_m2 = xavier(keys[6], H, H)
    b_m2 = bias(keys[7], H)
    w_o = xavier(keys[8], 1, H).T        # stored as (H, 1) column for the kernel
    b_o = bias(keys[9], 1)               # (1, 1)
    return (w_in, b_in, w_m1, b_m1, w_ch, w_ce, b_c, w_m2, b_m2, w_o, b_o)


def isdf_map_reference(x_pe, params, scale_output=1.0):
    """Pure-JAX reference (token-major) for correctness checking."""
    (w_in, b_in, w_m1, b_m1, w_ch, w_ce, b_c, w_m2, b_m2, w_o, b_o) = params
    sp = _softplus_beta100
    fc1 = sp(x_pe @ w_in.T + b_in.T)
    fc2 = sp(fc1 @ w_m1.T + b_m1.T)
    fc2_x = jnp.concatenate([fc2, x_pe], axis=-1)
    w_cat = jnp.concatenate([w_ch, w_ce], axis=1)
    fc3 = sp(fc2_x @ w_cat.T + b_c.T)
    fc4 = sp(fc3 @ w_m2.T + b_m2.T)
    raw = fc4 @ w_o + b_o.T
    return (raw * scale_output).squeeze(-1)


if __name__ == "__main__":
    POS_ENC_EMBEDDING_SIZE = 24   # e.g. 3 coords * (2 * n_freq) + 3 style PE
    HIDDEN_SIZE = 32
    SCALE_OUTPUT = 1.0
    N_POINTS = 640                # not a multiple of the tile -> exercises padding
    TILE_N = 256                  # small tile for the test; default is 2048

    key = jax.random.PRNGKey(0)
    k_param, k_x = jax.random.split(key)

    params = init_isdf_params(k_param, POS_ENC_EMBEDDING_SIZE, HIDDEN_SIZE)
    x_pe = jax.random.normal(k_x, (N_POINTS, POS_ENC_EMBEDDING_SIZE),
                             jnp.float32)

    alpha = isdf_map_forward(x_pe, params, scale_output=SCALE_OUTPUT,
                             tile_n=TILE_N)
    alpha = jax.block_until_ready(alpha)

    ref = isdf_map_reference(x_pe, params, SCALE_OUTPUT)
    assert alpha.shape == (N_POINTS,)
    assert jnp.allclose(alpha, ref, atol=1e-4, rtol=1e-4), (
        float(jnp.max(jnp.abs(alpha - ref))))

    print("KERNEL_OK")
</pallas_src>

<mosaic_0001>
module attributes {stable_mosaic.version = 11 : i64} {
  func.func @_isdf_kernel(%arg0: i32, %arg1: memref<24x256xf32, #tpu.memory_space<vmem>>, %arg2: memref<32x24xf32, #tpu.memory_space<vmem>>, %arg3: memref<32x1xf32, #tpu.memory_space<vmem>>, %arg4: memref<32x32xf32, #tpu.memory_space<vmem>>, %arg5: memref<32x1xf32, #tpu.memory_space<vmem>>, %arg6: memref<32x32xf32, #tpu.memory_space<vmem>>, %arg7: memref<32x24xf32, #tpu.memory_space<vmem>>, %arg8: memref<32x1xf32, #tpu.memory_space<vmem>>, %arg9: memref<32x32xf32, #tpu.memory_space<vmem>>, %arg10: memref<32x1xf32, #tpu.memory_space<vmem>>, %arg11: memref<32x1xf32, #tpu.memory_space<vmem>>, %arg12: memref<1x1xf32, #tpu.memory_space<vmem>>, %arg13: memref<1x256xf32, #tpu.memory_space<vmem>>) attributes {dimension_semantics = [#tpu.dimension_semantics<parallel>], iteration_bounds = array<i64: 3>, scalar_prefetch = 0 : i64, scratch_operands = 0 : i64, tpu.core_type = #tpu.core_type<tc>, window_params = [{transform_indices = @transform_0, window_bounds = array<i64: 24, 256>}, {pipeline_mode = #tpu.pipeline_mode<synchronous>, transform_indices = @transform_1, window_bounds = array<i64: 32, 24>}, {pipeline_mode = #tpu.pipeline_mode<synchronous>, transform_indices = @transform_2, window_bounds = array<i64: 32, 1>}, {pipeline_mode = #tpu.pipeline_mode<synchronous>, transform_indices = @transform_3, window_bounds = array<i64: 32, 32>}, {pipeline_mode = #tpu.pipeline_mode<synchronous>, transform_indices = @transform_4, window_bounds = array<i64: 32, 1>}, {pipeline_mode = #tpu.pipeline_mode<synchronous>, transform_indices = @transform_5, window_bounds = array<i64: 32, 32>}, {pipeline_mode = #tpu.pipeline_mode<synchronous>, transform_indices = @transform_6, window_bounds = array<i64: 32, 24>}, {pipeline_mode = #tpu.pipeline_mode<synchronous>, transform_indices = @transform_7, window_bounds = array<i64: 32, 1>}, {pipeline_mode = #tpu.pipeline_mode<synchronous>, transform_indices = @transform_8, window_bounds = array<i64: 32, 32>}, {pipeline_mode = #tpu.pipeline_mode<synchronous>, transform_indices = @transform_9, window_bounds = array<i64: 32, 1>}, {pipeline_mode = #tpu.pipeline_mode<synchronous>, transform_indices = @transform_10, window_bounds = array<i64: 32, 1>}, {pipeline_mode = #tpu.pipeline_mode<synchronous>, transform_indices = @transform_11, window_bounds = array<i64: 1, 1>}, {transform_indices = @transform_12, window_bounds = array<i64: 1, 256>}]} {
    %c0 = arith.constant 0 : index
    %c0_0 = arith.constant 0 : index
    %0 = vector.load %arg1[%c0, %c0_0] : memref<24x256xf32, #tpu.memory_space<vmem>>, vector<24x256xf32>
    %c0_1 = arith.constant 0 : index
    %c0_2 = arith.constant 0 : index
    %1 = vector.load %arg2[%c0_1, %c0_2] : memref<32x24xf32, #tpu.memory_space<vmem>>, vector<32x24xf32>
    %cst = arith.constant dense<0.000000e+00> : vector<32x256xf32>
    %2 = tpu.matmul %1, %0, %cst {dimension_numbers = #tpu.dot_dimension_numbers<[1], [0], [0], [1], [0, 0, 1, 1], [], []>} : vector<32x24xf32>, vector<24x256xf32>, vector<32x256xf32> -> vector<32x256xf32>
    %c0_3 = arith.constant 0 : index
    %c0_4 = arith.constant 0 : index
    %3 = vector.load %arg3[%c0_3, %c0_4] : memref<32x1xf32, #tpu.memory_space<vmem>>, vector<32x1xf32>
    %4 = vector.broadcast %3 : vector<32x1xf32> to vector<32x256xf32>
    %5 = arith.addf %2, %4 : vector<32x256xf32>
    %cst_5 = arith.constant 1.000000e+02 : f32
    %6 = vector.broadcast %cst_5 : f32 to vector<32x256xf32>
    %7 = arith.mulf %6, %5 : vector<32x256xf32>
    %cst_6 = arith.constant 2.000000e+01 : f32
    %8 = vector.broadcast %cst_6 : f32 to vector<32x256xf32>
    %9 = arith.minimumf %7, %8 : vector<32x256xf32>
    %cst_7 = arith.constant 2.000000e+01 : f32
    %10 = vector.broadcast %cst_7 : f32 to vector<32x256xf32>
    %11 = arith.cmpf ogt, %7, %10 : vector<32x256xf32>
    %12 = math.exp %9 : vector<32x256xf32>
    %13 = math.log1p %12 : vector<32x256xf32>
    %cst_8 = arith.constant 0.00999999977 : f32
    %14 = vector.broadcast %cst_8 : f32 to vector<32x256xf32>
    %15 = arith.mulf %13, %14 : vector<32x256xf32>
    %16 = arith.select %11, %5, %15 : vector<32x256xi1>, vector<32x256xf32>
    %c0_9 = arith.constant 0 : index
    %c0_10 = arith.constant 0 : index
    %17 = vector.load %arg4[%c0_9, %c0_10] : memref<32x32xf32, #tpu.memory_space<vmem>>, vector<32x32xf32>
    %cst_11 = arith.constant dense<0.000000e+00> : vector<32x256xf32>
    %18 = tpu.matmul %17, %16, %cst_11 {dimension_numbers = #tpu.dot_dimension_numbers<[1], [0], [0], [1], [0, 0, 1, 1], [], []>} : vector<32x32xf32>, vector<32x256xf32>, vector<32x256xf32> -> vector<32x256xf32>
    %c0_12 = arith.constant 0 : index
    %c0_13 = arith.constant 0 : index
    %19 = vector.load %arg5[%c0_12, %c0_13] : memref<32x1xf32, #tpu.memory_space<vmem>>, vector<32x1xf32>
    %20 = vector.broadcast %19 : vector<32x1xf32> to vector<32x256xf32>
    %21 = arith.addf %18, %20 : vector<32x256xf32>
    %cst_14 = arith.constant 1.000000e+02 : f32
    %22 = vector.broadcast %cst_14 : f32 to vector<32x256xf32>
    %23 = arith.mulf %22, %21 : vector<32x256xf32>
    %cst_15 = arith.constant 2.000000e+01 : f32
    %24 = vector.broadcast %cst_15 : f32 to vector<32x256xf32>
    %25 = arith.minimumf %23, %24 : vector<32x256xf32>
    %cst_16 = arith.constant 2.000000e+01 : f32
    %26 = vector.broadcast %cst_16 : f32 to vector<32x256xf32>
    %27 = arith.cmpf ogt, %23, %26 : vector<32x256xf32>
    %28 = math.exp %25 : vector<32x256xf32>
    %29 = math.log1p %28 : vector<32x256xf32>
    %cst_17 = arith.constant 0.00999999977 : f32
    %30 = vector.broadcast %cst_17 : f32 to vector<32x256xf32>
    %31 = arith.mulf %29, %30 : vector<32x256xf32>
    %32 = arith.select %27, %21, %31 : vector<32x256xi1>, vector<32x256xf32>
    %c0_18 = arith.constant 0 : index
    %c0_19 = arith.constant 0 : index
    %33 = vector.load %arg6[%c0_18, %c0_19] : memref<32x32xf32, #tpu.memory_space<vmem>>, vector<32x32xf32>
    %cst_20 = arith.constant dense<0.000000e+00> : vector<32x256xf32>
    %34 = tpu.matmul %33, %32, %cst_20 {dimension_numbers = #tpu.dot_dimension_numbers<[1], [0], [0], [1], [0, 0, 1, 1], [], []>} : vector<32x32xf32>, vector<32x256xf32>, vector<32x256xf32> -> vector<32x256xf32>
    %c0_21 = arith.constant 0 : index
    %c0_22 = arith.constant 0 : index
    %35 = vector.load %arg7[%c0_21, %c0_22] : memref<32x24xf32, #tpu.memory_space<vmem>>, vector<32x24xf32>
    %cst_23 = arith.constant dense<0.000000e+00> : vector<32x256xf32>
    %36 = tpu.matmul %35, %0, %cst_23 {dimension_numbers = #tpu.dot_dimension_numbers<[1], [0], [0], [1], [0, 0, 1, 1], [], []>} : vector<32x24xf32>, vector<24x256xf32>, vector<32x256xf32> -> vector<32x256xf32>
    %37 = arith.addf %34, %36 : vector<32x256xf32>
    %c0_24 = arith.constant 0 : index
    %c0_25 = arith.constant 0 : index
    %38 = vector.load %arg8[%c0_24, %c0_25] : memref<32x1xf32, #tpu.memory_space<vmem>>, vector<32x1xf32>
    %39 = vector.broadcast %38 : vector<32x1xf32> to vector<32x256xf32>
    %40 = arith.addf %37, %39 : vector<32x256xf32>
    %cst_26 = arith.constant 1.000000e+02 : f32
    %41 = vector.broadcast %cst_26 : f32 to vector<32x256xf32>
    %42 = arith.mulf %41, %40 : vector<32x256xf32>
    %cst_27 = arith.constant 2.000000e+01 : f32
    %43 = vector.broadcast %cst_27 : f32 to vector<32x256xf32>
    %44 = arith.minimumf %42, %43 : vector<32x256xf32>
    %cst_28 = arith.constant 2.000000e+01 : f32
    %45 = vector.broadcast %cst_28 : f32 to vector<32x256xf32>
    %46 = arith.cmpf ogt, %42, %45 : vector<32x256xf32>
    %47 = math.exp %44 : vector<32x256xf32>
    %48 = math.log1p %47 : vector<32x256xf32>
    %cst_29 = arith.constant 0.00999999977 : f32
    %49 = vector.broadcast %cst_29 : f32 to vector<32x256xf32>
    %50 = arith.mulf %48, %49 : vector<32x256xf32>
    %51 = arith.select %46, %40, %50 : vector<32x256xi1>, vector<32x256xf32>
    %c0_30 = arith.constant 0 : index
    %c0_31 = arith.constant 0 : index
    %52 = vector.load %arg9[%c0_30, %c0_31] : memref<32x32xf32, #tpu.memory_space<vmem>>, vector<32x32xf32>
    %cst_32 = arith.constant dense<0.000000e+00> : vector<32x256xf32>
    %53 = tpu.matmul %52, %51, %cst_32 {dimension_numbers = #tpu.dot_dimension_numbers<[1], [0], [0], [1], [0, 0, 1, 1], [], []>} : vector<32x32xf32>, vector<32x256xf32>, vector<32x256xf32> -> vector<32x256xf32>
    %c0_33 = arith.constant 0 : index
    %c0_34 = arith.constant 0 : index
    %54 = vector.load %arg10[%c0_33, %c0_34] : memref<32x1xf32, #tpu.memory_space<vmem>>, vector<32x1xf32>
    %55 = vector.broadcast %54 : vector<32x1xf32> to vector<32x256xf32>
    %56 = arith.addf %53, %55 : vector<32x256xf32>
    %cst_35 = arith.constant 1.000000e+02 : f32
    %57 = vector.broadcast %cst_35 : f32 to vector<32x256xf32>
    %58 = arith.mulf %57, %56 : vector<32x256xf32>
    %cst_36 = arith.constant 2.000000e+01 : f32
    %59 = vector.broadcast %cst_36 : f32 to vector<32x256xf32>
    %60 = arith.minimumf %58, %59 : vector<32x256xf32>
    %cst_37 = arith.constant 2.000000e+01 : f32
    %61 = vector.broadcast %cst_37 : f32 to vector<32x256xf32>
    %62 = arith.cmpf ogt, %58, %61 : vector<32x256xf32>
    %63 = math.exp %60 : vector<32x256xf32>
    %64 = math.log1p %63 : vector<32x256xf32>
    %cst_38 = arith.constant 0.00999999977 : f32
    %65 = vector.broadcast %cst_38 : f32 to vector<32x256xf32>
    %66 = arith.mulf %64, %65 : vector<32x256xf32>
    %67 = arith.select %62, %56, %66 : vector<32x256xi1>, vector<32x256xf32>
    %c0_39 = arith.constant 0 : index
    %c0_40 = arith.constant 0 : index
    %68 = vector.load %arg11[%c0_39, %c0_40] : memref<32x1xf32, #tpu.memory_space<vmem>>, vector<32x1xf32>
    %69 = vector.broadcast %68 : vector<32x1xf32> to vector<32x256xf32>
    %70 = arith.mulf %67, %69 : vector<32x256xf32>
    %cst_41 = arith.constant dense<0.000000e+00> : vector<256xf32>
    %71 = vector.multi_reduction <add>, %70, %cst_41 [0] : vector<32x256xf32> to vector<256xf32>
    %72 = vector.shape_cast %71 : vector<256xf32> to vector<1x256xf32>
    %c0_42 = arith.constant 0 : index
    %c0_43 = arith.constant 0 : index
    %73 = vector.load %arg12[%c0_42, %c0_43] : memref<1x1xf32, #tpu.memory_space<vmem>>, vector<1x1xf32>
    %74 = vector.broadcast %73 : vector<1x1xf32> to vector<1x256xf32>
    %75 = arith.addf %72, %74 : vector<1x256xf32>
    %cst_44 = arith.constant 1.000000e+00 : f32
    %76 = vector.broadcast %cst_44 : f32 to vector<1x256xf32>
    %77 = arith.mulf %75, %76 : vector<1x256xf32>
    %c0_45 = arith.constant 0 : index
    %c0_46 = arith.constant 0 : index
    %78 = vector.load %arg13[%c0_45, %c0_46] : memref<1x256xf32, #tpu.memory_space<vmem>>, vector<1x256xf32>
    tpu.vector_store %arg13[%c0_45, %c0_46], %77 {strides = array<i32>} : memref<1x256xf32, #tpu.memory_space<vmem>>, vector<1x256xf32>,
    return
  }
  func.func @transform_0(%arg0: i32) -> (i32, i32) {
    %c0_i32 = arith.constant 0 : i32
    %c0_i32_0 = arith.constant 0 : i32
    return %c0_i32, %arg0 : i32, i32
  }
  func.func @transform_1(%arg0: i32) -> (i32, i32) {
    %c0_i32 = arith.constant 0 : i32
    %c0_i32_0 = arith.constant 0 : i32
    %c0_i32_1 = arith.constant 0 : i32
    return %c0_i32, %c0_i32_0 : i32, i32
  }
  func.func @transform_2(%arg0: i32) -> (i32, i32) {
    %c0_i32 = arith.constant 0 : i32
    %c0_i32_0 = arith.constant 0 : i32
    %c0_i32_1 = arith.constant 0 : i32
    return %c0_i32, %c0_i32_0 : i32, i32
  }
  func.func @transform_3(%arg0: i32) -> (i32, i32) {
    %c0_i32 = arith.constant 0 : i32
    %c0_i32_0 = arith.constant 0 : i32
    %c0_i32_1 = arith.constant 0 : i32
    return %c0_i32, %c0_i32_0 : i32, i32
  }
  func.func @transform_4(%arg0: i32) -> (i32, i32) {
    %c0_i32 = arith.constant 0 : i32
    %c0_i32_0 = arith.constant 0 : i32
    %c0_i32_1 = arith.constant 0 : i32
    return %c0_i32, %c0_i32_0 : i32, i32
  }
  func.func @transform_5(%arg0: i32) -> (i32, i32) {
    %c0_i32 = arith.constant 0 : i32
    %c0_i32_0 = arith.constant 0 : i32
    %c0_i32_1 = arith.constant 0 : i32
    return %c0_i32, %c0_i32_0 : i32, i32
  }
  func.func @transform_6(%arg0: i32) -> (i32, i32) {
    %c0_i32 = arith.constant 0 : i32
    %c0_i32_0 = arith.constant 0 : i32
    %c0_i32_1 = arith.constant 0 : i32
    return %c0_i32, %c0_i32_0 : i32, i32
  }
  func.func @transform_7(%arg0: i32) -> (i32, i32) {
    %c0_i32 = arith.constant 0 : i32
    %c0_i32_0 = arith.constant 0 : i32
    %c0_i32_1 = arith.constant 0 : i32
    return %c0_i32, %c0_i32_0 : i32, i32
  }
  func.func @transform_8(%arg0: i32) -> (i32, i32) {
    %c0_i32 = arith.constant 0 : i32
    %c0_i32_0 = arith.constant 0 : i32
    %c0_i32_1 = arith.constant 0 : i32
    return %c0_i32, %c0_i32_0 : i32, i32
  }
  func.func @transform_9(%arg0: i32) -> (i32, i32) {
    %c0_i32 = arith.constant 0 : i32
    %c0_i32_0 = arith.constant 0 : i32
    %c0_i32_1 = arith.constant 0 : i32
    return %c0_i32, %c0_i32_0 : i32, i32
  }
  func.func @transform_10(%arg0: i32) -> (i32, i32) {
    %c0_i32 = arith.constant 0 : i32
    %c0_i32_0 = arith.constant 0 : i32
    %c0_i32_1 = arith.constant 0 : i32
    return %c0_i32, %c0_i32_0 : i32, i32
  }
  func.func @transform_11(%arg0: i32) -> (i32, i32) {
    %c0_i32 = arith.constant 0 : i32
    %c0_i32_0 = arith.constant 0 : i32
    %c0_i32_1 = arith.constant 0 : i32
    return %c0_i32, %c0_i32_0 : i32, i32
  }
  func.func @transform_12(%arg0: i32) -> (i32, i32) {
    %c0_i32 = arith.constant 0 : i32
    %c0_i32_0 = arith.constant 0 : i32
    return %c0_i32, %arg0 : i32, i32
  }
}

</mosaic_0001>

<bundles_post_ra>
// kernel: tpu_custom_call.1
= control target key start
LH: loop header
LB: loop body
LE: loop exit
PB: predicated region body
PF: predicated region fallthrough
CT: control target
= control target key end

     0   :  { %s2775_s0 = inlined_call_operand.hbm [shape: f32[24,768], index: 0, kind: input, shape index: {}]   ;;  %s2776_s1 = inlined_call_operand.vmem [shape: f32[32,24], index: 1, kind: input, shape index: {}]   ;;  %s2777_s2 = inlined_call_operand.vmem [shape: f32[32,1], index: 2, kind: input, shape index: {}]   ;;  %s2778_s3 = inlined_call_operand.vmem [shape: f32[32,32], index: 3, kind: input, shape index: {}]   ;;  %s2779_s4 = inlined_call_operand.vmem [shape: f32[32,1], index: 4, kind: input, shape index: {}]   ;;  %s2780_s5 = inlined_call_operand.vmem [shape: f32[32,32], index: 5, kind: input, shape index: {}]   ;;  %s2781_s6 = inlined_call_operand.vmem [shape: f32[32,24], index: 6, kind: input, shape index: {}]   ;;  %s2782_s7 = inlined_call_operand.vmem [shape: f32[32,1], index: 7, kind: input, shape index: {}]   ;;  %s2783_s8 = inlined_call_operand.vmem [shape: f32[32,32], index: 8, kind: input, shape index: {}]   ;;  %s2784_s9 = inlined_call_operand.vmem [shape: f32[32,1], index: 9, kind: input, shape index: {}]   ;;  %s2785_s10 = inlined_call_operand.vmem [shape: f32[32,1], index: 10, kind: input, shape index: {}]   ;;  %s2786_s11 = inlined_call_operand.<no memory space> [shape: f32[1,1], index: 11, kind: input, shape index: {}]   ;;  %s2787_s12 = inlined_call_operand.hbm [shape: f32[1,768], index: 12, kind: output, shape index: {}]  }
   0x1   :  { %v17_v0 = vstv %s2786_s11 }
   0x2   :  { %18 = vst [vmem:[#allocation2] sm:$0x1] %v17_v0 }
   0x3   :  { %19 = vsyncpa [#allocation4], 0 }
   0x4   :  { %21 = vsyncpa [#allocation4 + $0x1], 0 }
   0x5   :  { %22 = vsyncpa [#allocation5], 0 }
   0x6   :  { %24 = vsyncpa [#allocation5 + $0x1], 0  ;;  %s1999_s23 = smov 0   ;;  %s2001_s24 = smov 0  }
   0x7   :  { %s2003_s25 = smov 0   ;;  %s2005_s26 = smov 0  }
   0x8 LB: > { %2793 = sst [smem:[#allocation9_spill]] %s1913_s23  ;;  %s2020_s11 = sadd.s32 4294967295, %s1925_s26   ;;  %s1925_s26 = sphi %s2005_s26, %s2846_s26   ;;  %s1921_s25 = sphi %s2003_s25, %s2848_s25   ;;  %s1917_s24 = sphi %s2001_s24, %s2850_s24   ;;  %s1913_s23 = sphi %s1999_s23, %s2849_s23  }
   0x9   : > { %2794 = sst [smem:[#allocation10_spill]] %s1921_s25  ;;  %s1588_s27 = sadd.s32 4294967294, %s1925_s26  }
   0xa   : > { %s2024_s28 = sadd.s32 1, %s1925_s26   ;;  %s37_s29 = sadd.s32 1, %s1921_s25 }
   0xb   : > { %2795 = sst [smem:[#allocation11_spill]] %s2024_s28  ;;  %s34_s30 = ssub.s32 %s1925_s26, %s2024_s28 }
   0xc   : > { %p44_p0 = scmp.ne.s32.totalorder %s1921_s25, %s1917_s24  ;;  %p35_p1 = scmp.eq.s32.totalorder %s34_s30, 0 }
   0xd   : > { %p45_p2 = scmp.eq.s32.totalorder %s1925_s26, 0  ;;  %p50_p3 = scmp.ne.s32.totalorder %s1917_s24, %s1913_s23 }
   0xe   : > { %p51_p4 = scmp.eq.s32.totalorder %s2020_s11, 0  ;;  %p305_p7 = scmp.eq.s32.totalorder %s2020_s11, 2 }
   0xf   : > { %s2036_s13 = scalar_select %p35_p1, %s1921_s25, %s37_s29  }
  0x10   : > { %p46_p5 = por %p45_p2, %p44_p0  ;;  %p2038_p6 = por %p51_p4, %p50_p3 }
  0x11   : > { %2796 = sst [smem:[#allocation12_spill]] %s2036_s13  ;;  %p311_p8 = scmp.eq.s32.totalorder %s1588_s27, 2 }
  0x12   : > { %p1660_p9 = scmp.lt.s32.totalorder %s1925_s26, 3  ;;  %p2044_p10 = por %p305_p7, %p44_p0 }
  0x13   : > { %p2048_p11 = por %p311_p8, %p50_p3  ;;  %s364_s17 = sand.u32 1, %s1921_s25  }
  0x14   : > { %s1639_s18 = sshll.u32 %s1925_s26, 4  ;;  %s1646_s19 = smul.u32 48, %s364_s17 }
  0x15   : > { %s2799_s16 = scalar_select %p2048_p11, 1, 0 }
  0x16   : > { %s373_s22 = scalar_lea.hbm %s2775_s0, %s1639_s18  ;;  %p2057_p12 = pnand %p1660_p9, %p46_p5 }
  0x17   : > { %2800 = sst [smem:[#allocation13_spill]] %s2799_s16  ;;  %s374_s27 = sshll.u32 %s373_s22, 4  ;;  %s375_s27 = int_to_ptr.hbm [resolvable:$true] %s374_s27 }
  0x18   : > { %s368_s30 = scalar_lea.vmem [#allocation3], %s1646_s19  ;;  %p1593_p13 = scmp.ge.s32.totalorder %s1925_s26, 1 }
  0x19   : > { %s376_s13 = sshll.u32 %s368_s30, 4  ;;  %s365_s28 = scalar_lea.sflag [#allocation4], %s364_s17  ;;  %s377_s13 = int_to_ptr.vmem [resolvable:$true] %s376_s13 }
  0x1a   : > { %s1829_s16 = sshra.s32 %s375_s27, 4  ;;  %p1833_p1 = pneg %p2057_p12  ;;  %s1830_s16 = int_to_ptr.hbm [resolvable:$true] %s1829_s16 }
  0x1b   : > { %s1831_s25 = scalar_lea.hbm %s1830_s16, 48  ;;  %s1836_s21 = scalar_lea.hbm %s2775_s0, 144 }
  0x1c   : > { %p1832_p0 = scmp.ne.s32.totalorder %s1830_s16, %s1831_s25  ;;  %p1837_p4 = scmp.lt.s32.totalorder %s1830_s16, %s2775_s0 }
  0x1d   : > { %p1838_p5 = scmp.lt.s32.totalorder %s1836_s21, %s1831_s25 }
  0x1e   : > { %p1834_p2 = pnand %p1833_p1, %p1832_p0 }
  0x1f   : > { %p1839_p7 = por %p1838_p5, %p1837_p4 }
  0x20   : > { %p1835_p3 = pneg %p1834_p2 }
  0x22   : > { %p1840_p8 = pnand %p1839_p7, %p1835_p3 }
  0x24   : > { %1843 = shalt.err (!%p1840_p8)
}
  0x25   : > { %s1927_s17 = smov 768   ;;  %s1928_s19 = smov 256  }
  0x26   : > { %s1929_s30 = smov 16   ;;  %p384_p9 = scmp.lt.s32.totalorder %s1925_s26, 4 }
  0x27   : > { %1655 = dma.hbm_to_vmem [thread:$0]  (!%p2057_p12), %s375_s27, 768, %s377_s13, %s365_s28, %s1927_s17, %s1928_s19, %s1929_s30  }
  0x28   : > { %p385_p0 = pnand %p1593_p13, %p384_p9 }
  0x29   : > { %s2076_s23 = sand.u32 (!%p385_p0), 1, %s1917_s24  }
  0x2a   : > { %388 = sbr.rel (%p385_p0) target bundleno = 831 (0x33f), region = 68  ;;  %s391_s16 = scalar_lea.sflag (!%p385_p0), [#allocation4], %s2076_s23 }
  0x2b   : > { %s1647_s25 = smul.u32 (!%p385_p0), 48, %s2076_s23 }
  0x2d   : > { %s394_s18 = scalar_lea.vmem (!%p385_p0), [#allocation3], %s1647_s25 }
  0x2f   : > { %1904 = dma.done.wait (%p2038_p6), %s391_s16, 768  }
  0x30   : > { %1906 = vsyncadd (%p2038_p6), %s391_s16, 4294966528  ;;  %v1930_v1 = vmov 0   ;;  %v451_v2 = vld [vmem:[%s2777_s2 + $0x18] sm:$0xff]  ;;  %v449_v3 = vld [vmem:[%s2777_s2 + $0x8] sm:$0xff]  ;;  %vm472_vm0 = vcmask 195584   ;;  %s1594_s30 = sshll.u32 %s2076_s23, 1 }
  0x31   : > { %1699 = vset.pattern.permute.xlu1 %v1930_v1  ;;  %1698 = vset.pattern.permute.xlu0 %v1930_v1  ;;  %v442_v4 = vld [vmem:[%s394_s18 + $0x20] sm:$0xff]  ;;  %v443_v5 = vld [vmem:[%s394_s18 + $0x28] sm:$0xff]  ;;  %v440_v6 = vld [vmem:[%s394_s18 + $0x10] sm:$0xff]  ;;  %s1636_s25 = sshll.u32 %s2020_s11, 1  ;;  %s435_s13 = scalar_lea.vmem [#allocation6], %s1594_s30 }
  0x32   : > { %1700 = vset.pattern.permute.xlu2 %v1930_v1  ;;  %469 = vperm.xlu0 %1698, %v451_v2   ;;  %v441_v7 = vld [vmem:[%s394_s18 + $0x18] sm:$0xff]  ;;  %v438_v8 = vld [vmem:[%s394_s18] sm:$0xff]  ;;  %v439_v9 = vld [vmem:[%s394_s18 + $0x8] sm:$0xff]  ;;  %s1513_s28 = scalar_lea.hbm %s2787_s12, %s1636_s25  ;;  %s1515_s29 = sshll.u32 %s435_s13, 4  ;;  %s1516_s29 = int_to_ptr.vmem [resolvable:$true] %s1515_s29 }
  0x33   : > { %459 = vperm.xlu1 %1699, %v449_v3   ;;  %498 = vmatpush.msra.mxu0 %v442_v4  ;;  %v444_v10 = vld [vmem:[%s2776_s1] sm:$0xff]  ;;  %v446_v11 = vld [vmem:[%s2776_s1 + $0x10] sm:$0xff]  ;;  %v445_v14 = vld [vmem:[%s2776_s1 + $0x8] sm:$0xff]  ;;  %s1517_s27 = sshll.u32 %s1513_s28, 4  ;;  %s1503_s11 = scalar_lea.sflag [#allocation5], %s2076_s23  ;;  %s1518_s27 = int_to_ptr.hbm [resolvable:$true] %s1517_s27 }
  0x34   : > { %1640 = vmatpush.msra.mxu2 %v442_v4  ;;  %527 = vmatpush.msra.mxu1 %v443_v5  ;;  %v450_v12 = vld [vmem:[%s2777_s2 + $0x10] sm:$0xff]  ;;  %v448_v13 = vld [vmem:[%s2777_s2] sm:$0xff]  ;;  %v447_v15 = vld [vmem:[%s2776_s1 + $0x18] sm:$0xff]  ;;  %s1873_s14 = sshra.s32 %s1518_s27, 4  ;;  %s1879_s17 = scalar_lea.hbm %s2787_s12, 6  ;;  %s1874_s14 = int_to_ptr.hbm [resolvable:$true] %s1873_s14 }
  0x35   : > { %1643 = vmatpush.msra.mxu3 %v443_v5  ;;  %499 = vmatpush.msra.mxu0 %v440_v6  ;;  %v676_v16 = vld [vmem:[%s2779_s4 + $0x8] sm:$0xff]  ;;  %v675_v17 = vld [vmem:[%s2779_s4] sm:$0xff]  ;;  %v1048_v18 = vld [vmem:[%s2782_s7 + $0x10] sm:$0xff]  ;;  %s1875_s20 = scalar_lea.hbm %s1874_s14, 2  ;;  %p1880_p1 = scmp.lt.s32.totalorder %s1874_s14, %s2787_s12 }
  0x36   : > { %1641 = vmatpush.msra.mxu2 %v440_v6  ;;  %528 = vmatpush.msra.mxu1 %v441_v7  ;;  %v1047_v19 = vld [vmem:[%s2782_s7 + $0x8] sm:$0xff]  ;;  %v1210_v20 = vld [vmem:[%s2784_s9] sm:$0xff]  ;;  %v1213_v22 = vld [vmem:[%s2784_s9 + $0x18] sm:$0xff]  ;;  %p1876_p6 = scmp.ne.s32.totalorder %s1874_s14, %s1875_s20  ;;  %p1881_p2 = scmp.lt.s32.totalorder %s1879_s17, %s1875_s20 }
  0x37   : > { %1644 = vmatpush.msra.mxu3 %v441_v7  ;;  %500 = vmatpush.msra.mxu0 %v438_v8  ;;  %v1211_v21 = vld [vmem:[%s2784_s9 + $0x8] sm:$0xff]  ;;  %v1432_v23 = vld [vmem:[%s2785_s10] sm:$0xff]  ;;  %v1434_v24 = vld [vmem:[%s2785_s10 + $0x10] sm:$0xff] }
  0x38   : > { %1642 = vmatpush.msra.mxu2 %v438_v8  ;;  %529 = vmatpush.msra.mxu1 %v439_v9  ;;  %v1435_v25 = vld [vmem:[%s2785_s10 + $0x18] sm:$0xff]  ;;  %p1877_p12 = pnand %p1876_p6, %p2044_p10  ;;  %p1882_p3 = por %p1881_p2, %p1880_p1 }
  0x39   : > { %1645 = vmatpush.msra.mxu3 %v439_v9  ;;  %1595 = vmatmul.msk.f32.vlgmr.msra.gmra.mxu0 %vm472_vm0, %v444_v10 }
  0x3a   : > { %1597 = vmatmul.msk.f32.vlgmr.msra.gmra.mxu2 %vm472_vm0, %v446_v11  ;;  %1599 = vmatmul.msk.f32.vlgmr.msra.gmra.mxu1 %vm472_vm0, %v444_v10  ;;  %p1878_p13 = pneg %p1877_p12 }
  0x3b   : > { %1601 = vmatmul.msk.f32.vlgmr.msra.gmra.mxu3 %vm472_vm0, %v446_v11  ;;  %464 = vperm.xlu0 %1698, %v450_v12  }
  0x3c   : > { %454 = vperm.xlu1 %1699, %v448_v13   ;;  %931 = vmatpush.msrb.mxu0 %v442_v4  ;;  %p1883_p4 = pnand %p1882_p3, %p1878_p13 }
  0x3d   : > { %960 = vmatpush.msrb.mxu1 %v443_v5 }
  0x3e   : > { %932 = vmatpush.msrb.mxu0 %v440_v6 }
  0x3f   : > { %961 = vmatpush.msrb.mxu1 %v441_v7 }
  0x40   : > { %933 = vmatpush.msrb.mxu0 %v438_v8 }
  0x41   : > { %962 = vmatpush.msrb.mxu1 %v439_v9  ;;  %1596 = vmatmul.msk.f32.gmra.mxu0 %vm472_vm0, %v445_v14 }
  0x42   : > { %1598 = vmatmul.msk.f32.gmra.mxu2 %vm472_vm0, %v447_v15  ;;  %1600 = vmatmul.msk.f32.gmra.mxu1 %vm472_vm0, %v445_v14 }
  0x43   : > { %1602 = vmatmul.msk.f32.gmra.mxu3 %vm472_vm0, %v447_v15  ;;  %686 = vperm.xlu0 %1698, %v676_v16  }
  0x44   : > { %681 = vperm.xlu1 %1699, %v675_v17  }
  0x4b   : > { %1062 = vperm.xlu0 %1698, %v1048_v18  }
  0x4c   : > { %1057 = vperm.xlu1 %1699, %v1047_v19  }
  0x53   : > { %1216 = vperm.xlu0 %1698, %v1210_v20  }
  0x54   : > { %1221 = vperm.xlu1 %1699, %v1211_v21  }
  0x5b   : > { %1231 = vperm.xlu0 %1698, %v1213_v22  }
  0x5c   : > { %1438 = vperm.xlu1 %1699, %v1432_v23  }
  0x63   : > { %1448 = vperm.xlu0 %1698, %v1434_v24  }
  0x64   : > { %1453 = vperm.xlu1 %1699, %v1435_v25  }
  0xa4   : > { %v470_v27 = vpop.permute.xlu0 %469 }
  0xa5   : > { %v460_v26 = vpop.permute.xlu1 %459 }
  0xad   : > { %v465_v36 = vpop.permute.xlu0 %464 }
  0xae   : > { %v455_v28 = vpop.permute.xlu1 %454 }
  0xb6   : > { %v502_v29 = vpop.f32.mrf.mxu0 }
  0xb7   : > { %v2146_v30 = vadd.f32 %v502_v29, %v455_v28  ;;  %v531_v31 = vpop.f32.mrf.mxu1 }
  0xb8   : > { %v2148_v32 = vadd.f32 %v531_v31, %v455_v28 }
  0xb9   : > { %v2151_v33 = vmul.f32 100.0, %v2146_v30 }
  0xba   : > { %v2154_v34 = vmul.f32 100.0, %v2148_v32 }
  0xbb   : > { %v551_v35 = vmin.f32 %v2151_v33, 20.0  ;;  %vm559_vm15 = vcmp.gt.f32.partialorder %v2151_v33, 20.0  ;;  %v672_v33 = vld [vmem:[%s2778_s3 + $0x8] sm:$0xff] }
  0xbc   : > { %v552_v37 = vmin.f32 %v2154_v34, 20.0 }
  0xbd   : > { %v508_v38 = vpop.f32.mrf.mxu2  ;;  %v567_v39 = vmul.f32 1.442695, %v551_v35 }
  0xbe   : > { %v2158_v40 = vadd.f32 %v508_v38, %v465_v36  ;;  %v537_v41 = vpop.f32.mrf.mxu3  ;;  %v569_v42 = vmul.f32 1.442695, %v552_v37  ;;  %v505_v44 = vpop.f32.mrf.mxu0 }
  0xbf   : > { %v2160_v43 = vadd.f32 %v537_v41, %v465_v36  ;;  %1701 = vpow2.f32 %v567_v39  ;;  %v2165_v46 = vadd.f32 %v505_v44, %v460_v26  ;;  %v534_v47 = vpop.f32.mrf.mxu1 }
  0xc0   : > { %v2163_v45 = vmul.f32 100.0, %v2158_v40  ;;  %v2170_v49 = vadd.f32 %v534_v47, %v460_v26  ;;  %1703 = vpow2.f32 %v569_v42 }
  0xc1   : > { %v2168_v48 = vmul.f32 100.0, %v2160_v43  ;;  %v2174_v51 = vmul.f32 100.0, %v2165_v46 }
  0xc2   : > { %v555_v50 = vmin.f32 %v2163_v45, 20.0  ;;  %v2178_v53 = vmul.f32 100.0, %v2170_v49  ;;  %vm563_vm11 = vcmp.gt.f32.partialorder %v2163_v45, 20.0 }
  0xc3   : > { %v556_v52 = vmin.f32 %v2168_v48, 20.0  ;;  %v553_v55 = vmin.f32 %v2174_v51, 20.0  ;;  %vm564_vm12 = vcmp.gt.f32.partialorder %v2168_v48, 20.0  ;;  %vm561_vm13 = vcmp.gt.f32.partialorder %v2174_v51, 20.0  ;;  %v1046_v48 = vld [vmem:[%s2782_s7] sm:$0xff] }
  0xc4   : > { %v575_v54 = vmul.f32 1.442695, %v555_v50  ;;  %v554_v57 = vmin.f32 %v2178_v53, 20.0  ;;  %vm562_vm14 = vcmp.gt.f32.partialorder %v2178_v53, 20.0  ;;  %v1482_v51 = vld [vmem:[#allocation2] sm:$0x1] }
  0xc5   : > { %v577_v56 = vmul.f32 1.442695, %v556_v52  ;;  %v511_v58 = vpop.f32.mrf.mxu2  ;;  %v2182_v59 = vpop.eup %1701  ;;  %v571_v60 = vmul.f32 1.442695, %v553_v55 }
  0xc6   : > { %1705 = vpow2.f32 %v575_v54  ;;  %v2184_v61 = vadd.f32 %v511_v58, %v470_v27  ;;  %v540_v62 = vpop.f32.mrf.mxu3  ;;  %v573_v63 = vmul.f32 1.442695, %v554_v57  ;;  %v2191_v2 = vpop.eup %1703  ;;  %v583_v4 = vadd.f32 1.0, %v2182_v59 }
  0xc7   : > { %1707 = vpow2.f32 %v577_v56  ;;  %v2186_v0 = vadd.f32 %v540_v62, %v470_v27  ;;  %v592_v9 = vadd.f32 1.0, %v2191_v2  ;;  %v586_v18 = vmul.f32 -0.5, %v2182_v59  ;;  %v678_v27 = vld [vmem:[%s2779_s4 + $0x18] sm:$0xff] }
  0xc8   : > { %1709 = vpow2.f32 %v571_v60  ;;  %v2189_v1 = vmul.f32 100.0, %v2184_v61  ;;  %v595_v19 = vmul.f32 -0.5, %v2191_v2  ;;  %v589_v22 = vand.u32 2147483647, %v2182_v59  ;;  %696 = vperm.xlu2 %1700, %v678_v27  }
  0xc9   : > { %1711 = vpow2.f32 %v573_v63  ;;  %v2194_v3 = vmul.f32 100.0, %v2186_v0  ;;  %v587_v36 = vadd.f32 1.0, %v586_v18  ;;  %v598_v54 = vand.u32 2147483647, %v2191_v2  ;;  %v682_v63 = vpop.permute.xlu1 %681 }
  0xca   : > { %v557_v5 = vmin.f32 %v2189_v1, 20.0  ;;  %1713 = vlog2.f32 %v583_v4  ;;  %v596_v42 = vadd.f32 1.0, %v595_v19  ;;  %vm2220_vm1 = vcmp.lt.f32.partialorder %v589_v22, 0.0004427343 }
  0xcb   : > { %v558_v6 = vmin.f32 %v2194_v3, 20.0  ;;  %vm2256_vm8 = vcmp.lt.f32.partialorder %v598_v54, 0.0004427343  ;;  %vm565_vm9 = vcmp.gt.f32.partialorder %v2189_v1, 20.0  ;;  %vm566_vm10 = vcmp.gt.f32.partialorder %v2194_v3, 20.0  ;;  %v1049_v1 = vld [vmem:[%s2782_s7 + $0x18] sm:$0xff] }
  0xcc   : > { %v2199_v7 = vpop.eup %1705  ;;  %v579_v8 = vmul.f32 1.442695, %v557_v5  ;;  %v588_v5 = vmul.f32 %v2182_v59, %v587_v36 }
  0xcd   : > { %v2202_v10 = vpop.eup %1707  ;;  %v581_v11 = vmul.f32 1.442695, %v558_v6  ;;  %v619_v12 = vadd.f32 1.0, %v2199_v7  ;;  %v622_v21 = vmul.f32 -0.5, %v2199_v7  ;;  %v625_v24 = vand.u32 2147483647, %v2199_v7 }
  0xce   : > { %v1710_v13 = vpop.eup %1709  ;;  %1715 = vpow2.f32 %v579_v8  ;;  %v628_v14 = vadd.f32 1.0, %v2202_v10  ;;  %v631_v25 = vmul.f32 -0.5, %v2202_v10  ;;  %v634_v31 = vand.u32 2147483647, %v2202_v10 }
  0xcf   : > { %v2206_v15 = vpop.eup %1711  ;;  %1717 = vpow2.f32 %v581_v11  ;;  %v601_v16 = vadd.f32 1.0, %v1710_v13  ;;  %v604_v26 = vmul.f32 -0.5, %v1710_v13  ;;  %v607_v35 = vand.u32 2147483647, %v1710_v13 }
  0xd0   : > { %1719 = vlog2.f32 %v592_v9  ;;  %v610_v17 = vadd.f32 1.0, %v2206_v15  ;;  %v1714_v20 = vpop.eup %1713  ;;  %v613_v41 = vmul.f32 -0.5, %v2206_v15  ;;  %v623_v50 = vadd.f32 1.0, %v622_v21 }
  0xd1   : > { %1721 = vlog2.f32 %v619_v12  ;;  %vm2225_vm2 = vcmp.lt.f32.partialorder %v625_v24, 0.0004427343  ;;  %v632_v57 = vadd.f32 1.0, %v631_v25  ;;  %v605_v58 = vadd.f32 1.0, %v604_v26  ;;  %v677_v25 = vld [vmem:[%s2779_s4 + $0x10] sm:$0xff] }
  0xd2   : > { %1723 = vlog2.f32 %v628_v14  ;;  %vm2229_vm3 = vcmp.lt.f32.partialorder %v634_v31, 0.0004427343  ;;  %vm2233_vm4 = vcmp.lt.f32.partialorder %v607_v35, 0.0004427343  ;;  %v616_v4 = vand.u32 2147483647, %v2206_v15  ;;  %691 = vperm.xlu2 %1700, %v677_v25  }
  0xd3   : > { %1725 = vlog2.f32 %v601_v16  ;;  %v614_v11 = vadd.f32 1.0, %v613_v41  ;;  %v585_v12 = vmul.f32 0.6931472, %v1714_v20  ;;  %v633_v21 = vmul.f32 %v2202_v10, %v632_v57 }
  0xd4   : > { %v1716_v23 = vpop.eup %1715  ;;  %1727 = vlog2.f32 %v610_v17  ;;  %v624_v17 = vmul.f32 %v2199_v7, %v623_v50  ;;  %v606_v24 = vmul.f32 %v1710_v13, %v605_v58  ;;  %vm2244_vm5 = vcmp.lt.f32.partialorder %v616_v4, 0.0004427343 }
  0xd5   : > { %v1718_v28 = vpop.eup %1717  ;;  %v637_v29 = vadd.f32 1.0, %v1716_v23  ;;  %v640_v38 = vmul.f32 -0.5, %v1716_v23  ;;  %v643_v14 = vand.u32 2147483647, %v1716_v23  ;;  %v615_v13 = vmul.f32 %v2206_v15, %v614_v11 }
  0xd6   : > { %v1720_v37 = vpop.eup %1719  ;;  %v646_v39 = vadd.f32 1.0, %v1718_v28  ;;  %v649_v47 = vmul.f32 -0.5, %v1718_v28  ;;  %v652_v19 = vand.u32 2147483647, %v1718_v28  ;;  %v591_v50 = vsel %vm2220_vm1, %v588_v5, %v585_v12 }
  0xd7   : > { %v1722_v44 = vpop.eup %1721  ;;  %1729 = vlog2.f32 %v637_v29  ;;  %v641_v8 = vadd.f32 1.0, %v640_v38  ;;  %v594_v20 = vmul.f32 0.6931472, %v1720_v37  ;;  %v597_v29 = vmul.f32 %v2191_v2, %v596_v42 }
  0xd8   : > { %v1724_v55 = vpop.eup %1723  ;;  %1731 = vlog2.f32 %v646_v39  ;;  %v621_v9 = vmul.f32 0.6931472, %v1722_v44  ;;  %v650_v16 = vadd.f32 1.0, %v649_v47  ;;  %vm644_vm6 = vcmp.lt.f32.partialorder %v643_v14, 0.0004427343 }
  0xd9   : > { %v1726_v60 = vpop.eup %1725  ;;  %v630_v18 = vmul.f32 0.6931472, %v1724_v55  ;;  %v642_v35 = vmul.f32 %v1716_v23, %v641_v8  ;;  %vm653_vm7 = vcmp.lt.f32.partialorder %v652_v19, 0.0004427343  ;;  %v600_v56 = vsel %vm2256_vm8, %v597_v29, %v594_v20 }
  0xda   : > { %v1728_v6 = vpop.eup %1727  ;;  %v603_v22 = vmul.f32 0.6931472, %v1726_v60  ;;  %v627_v10 = vsel %vm2225_vm2, %v624_v17, %v621_v9  ;;  %v651_v38 = vmul.f32 %v1718_v28, %v650_v16  ;;  %1067 = vperm.xlu2 %1700, %v1049_v1   ;;  %vm699_vm1 = vcmask 261120   ;;  %v687_v9 = vpop.permute.xlu0 %686 }
  0xdb   : > { %v612_v26 = vmul.f32 0.6931472, %v1728_v6  ;;  %v636_v39 = vsel %vm2229_vm3, %v633_v21, %v630_v18  ;;  %v659_v44 = vmul.f32 0.01, %v627_v10  ;;  %vm560_vm2 = vcmp.gt.f32.partialorder %v2154_v34, 20.0  ;;  %v1433_v34 = vld [vmem:[%s2785_s10 + $0x8] sm:$0xff] }
  0xdc   : > { %v609_v2 = vsel %vm2233_vm4, %v606_v24, %v603_v22  ;;  %v660_v47 = vmul.f32 0.01, %v636_v39 }
  0xdd   : > { %v1730_v59 = vpop.eup %1729  ;;  %v618_v15 = vsel %vm2244_vm5, %v615_v13, %v612_v26  ;;  %v657_v54 = vmul.f32 0.01, %v609_v2  ;;  %v667_v52 = vsel %vm563_vm11, %v2158_v40, %v659_v44  ;;  %v671_v40 = vld [vmem:[%s2778_s3] sm:$0xff] }
  0xde   : > { %v1732_v7 = vpop.eup %1731  ;;  %v639_v31 = vmul.f32 0.6931472, %v1730_v59  ;;  %v658_v58 = vmul.f32 0.01, %v618_v15  ;;  %v668_v3 = vsel %vm564_vm12, %v2160_v43, %v660_v47 }
  0xdf   : > { %v648_v36 = vmul.f32 0.6931472, %v1732_v7  ;;  %v665_v45 = vsel %vm561_vm13, %v2165_v46, %v657_v54 }
  0xe0   : > { %v645_v41 = vsel %vm644_vm6, %v642_v35, %v639_v31  ;;  %v666_v60 = vsel %vm562_vm14, %v2170_v49, %v658_v58  ;;  %v674_v49 = vld [vmem:[%s2778_s3 + $0x18] sm:$0xff] }
  0xe1   : > { %v661_v23 = vmul.f32 0.01, %v645_v41  ;;  %v654_v42 = vsel %vm653_vm7, %v651_v38, %v648_v36 }
  0xe2   : > { %v662_v28 = vmul.f32 0.01, %v654_v42  ;;  %1052 = vperm.xlu2 %1700, %v1046_v48  }
  0xe3   : > { %v669_v55 = vsel %vm565_vm9, %v2184_v61, %v661_v23  ;;  %v655_v61 = vmul.f32 0.01, %v591_v50 }
  0xe4   : > { %724 = vmatpush.msrb.mxu2 %v669_v55  ;;  %v670_v57 = vsel %vm566_vm10, %v2186_v0, %v662_v28  ;;  %v656_v0 = vmul.f32 0.01, %v600_v56 }
  0xe5   : > { %753 = vmatpush.msrb.mxu3 %v670_v57  ;;  %v663_v43 = vsel %vm559_vm15, %v2146_v30, %v655_v61  ;;  %v1212_v30 = vld [vmem:[%s2784_s9 + $0x10] sm:$0xff] }
  0xe6   : > { %725 = vmatpush.msrb.mxu2 %v667_v52  ;;  %v664_v46 = vsel %vm560_vm2, %v2148_v32, %v656_v0  ;;  %v673_v32 = vld [vmem:[%s2778_s3 + $0x10] sm:$0xff] }
  0xe7   : > { %754 = vmatpush.msrb.mxu3 %v668_v3  ;;  %v902_v3 = vld [vmem:[%s2781_s6] sm:$0xff] }
  0xe8   : > { %726 = vmatpush.msrb.mxu2 %v665_v45  ;;  %1611 = vmatmul.msk.f32.vlgmr.msrb.gmra.mxu0 %vm472_vm0, %v902_v3 }
  0xe9   : > { %755 = vmatpush.msrb.mxu3 %v666_v60  ;;  %1615 = vmatmul.msk.f32.vlgmr.msrb.gmra.mxu1 %vm472_vm0, %v902_v3 }
  0xea   : > { %727 = vmatpush.msrb.mxu2 %v663_v43  ;;  %1226 = vperm.xlu2 %1700, %v1212_v30  }
  0xeb   : > { %756 = vmatpush.msrb.mxu3 %v664_v46  ;;  %1603 = vmatmul.msk.f32.vlgmr.msrb.gmra.mxu2 %vm699_vm1, %v671_v40 }
  0xec   : > { %1607 = vmatmul.msk.f32.vlgmr.msrb.gmra.mxu3 %vm699_vm1, %v671_v40 }
  0xf2   : > { %1443 = vperm.xlu2 %1700, %v1433_v34  }
  0xf3   : > { %1604 = vmatmul.msk.f32.gmra.mxu2 %vm699_vm1, %v672_v33 }
  0xf4   : > { %1608 = vmatmul.msk.f32.gmra.mxu3 %vm699_vm1, %v672_v33 }
  0xfa   : > { %1485 = vperm.xlu2 %1700, %v1482_v51  }
  0xfb   : > { %1605 = vmatmul.msk.f32.gmra.mxu2 %vm699_vm1, %v673_v32 }
  0xfc   : > { %1609 = vmatmul.msk.f32.gmra.mxu3 %vm699_vm1, %v673_v32 }
 0x103   : > { %1606 = vmatmul.msk.f32.gmra.mxu2 %vm699_vm1, %v674_v49 }
 0x104   : > { %1610 = vmatmul.msk.f32.gmra.mxu3 %vm699_vm1, %v674_v49 }
 0x122   : > { %v697_v5 = vpop.permute.xlu2 %696 }
 0x12c   : > { %v692_v59 = vpop.permute.xlu2 %691 }
 0x16e   : > { %v729_v53 = vpop.f32.mrf.mxu2 }
 0x16f   : > { %v758_v62 = vpop.f32.mrf.mxu3  ;;  %v2314_v4 = vadd.f32 %v729_v53, %v682_v63 }
 0x170   : > { %v2316_v6 = vadd.f32 %v758_v62, %v682_v63  ;;  %v903_v62 = vld [vmem:[%s2781_s6 + $0x8] sm:$0xff] }
 0x171   : > { %v2319_v8 = vmul.f32 100.0, %v2314_v4  ;;  %1612 = vmatmul.msk.f32.gmra.mxu0 %vm472_vm0, %v903_v62  ;;  %1616 = vmatmul.msk.f32.gmra.mxu1 %vm472_vm0, %v903_v62 }
 0x172   : > { %v2324_v16 = vmul.f32 100.0, %v2316_v6 }
 0x173   : > { %v778_v18 = vmin.f32 %v2319_v8, 20.0 }
 0x174   : > { %v779_v22 = vmin.f32 %v2324_v16, 20.0 }
 0x175   : > { %v794_v24 = vmul.f32 1.442695, %v778_v18 }
 0x176   : > { %v732_v11 = vpop.f32.mrf.mxu2  ;;  %v796_v7 = vmul.f32 1.442695, %v779_v22 }
 0x177   : > { %v2321_v12 = vadd.f32 %v732_v11, %v687_v9  ;;  %v761_v14 = vpop.f32.mrf.mxu3  ;;  %1733 = vpow2.f32 %v794_v24 }
 0x178   : > { %v2326_v17 = vadd.f32 %v761_v14, %v687_v9  ;;  %1735 = vpow2.f32 %v796_v7 }
 0x179   : > { %v2330_v19 = vmul.f32 100.0, %v2321_v12 }
 0x17a   : > { %v2333_v21 = vmul.f32 100.0, %v2326_v17 }
 0x17b   : > { %v780_v25 = vmin.f32 %v2330_v19, 20.0  ;;  %vm788_vm15 = vcmp.gt.f32.partialorder %v2330_v19, 20.0 }
 0x17c   : > { %v781_v26 = vmin.f32 %v2333_v21, 20.0  ;;  %vm789_vm2 = vcmp.gt.f32.partialorder %v2333_v21, 20.0 }
 0x17d   : > { %v798_v35 = vmul.f32 1.442695, %v780_v25  ;;  %v2350_v23 = vpop.eup %1733 }
 0x17e   : > { %v735_v27 = vpop.f32.mrf.mxu2  ;;  %v800_v13 = vmul.f32 1.442695, %v781_v26  ;;  %v2359_v47 = vpop.eup %1735  ;;  %v810_v55 = vadd.f32 1.0, %v2350_v23  ;;  %v813_v48 = vmul.f32 -0.5, %v2350_v23  ;;  %v816_v14 = vand.u32 2147483647, %v2350_v23 }
 0x17f   : > { %v2338_v20 = vadd.f32 %v735_v27, %v692_v59  ;;  %v764_v29 = vpop.f32.mrf.mxu3  ;;  %1737 = vpow2.f32 %v798_v35  ;;  %v819_v61 = vadd.f32 1.0, %v2359_v47  ;;  %v822_v33 = vmul.f32 -0.5, %v2359_v47 }
 0x180   : > { %v2340_v31 = vadd.f32 %v764_v29, %v692_v59  ;;  %1739 = vpow2.f32 %v800_v13  ;;  %v814_v11 = vadd.f32 1.0, %v813_v48  ;;  %v825_v59 = vand.u32 2147483647, %v2359_v47 }
 0x181   : > { %v2343_v10 = vmul.f32 100.0, %v2338_v20  ;;  %v823_v25 = vadd.f32 1.0, %v822_v33  ;;  %vm2406_vm4 = vcmp.lt.f32.partialorder %v816_v14, 0.0004427343 }
 0x182   : > { %v2346_v36 = vmul.f32 100.0, %v2340_v31  ;;  %vm2412_vm5 = vcmp.lt.f32.partialorder %v825_v59, 0.0004427343 }
 0x183   : > { %v782_v38 = vmin.f32 %v2343_v10, 20.0  ;;  %vm790_vm13 = vcmp.gt.f32.partialorder %v2343_v10, 20.0 }
 0x184   : > { %v783_v39 = vmin.f32 %v2346_v36, 20.0  ;;  %vm791_vm14 = vcmp.gt.f32.partialorder %v2346_v36, 20.0  ;;  %v898_v36 = vld [vmem:[%s2780_s5] sm:$0xff] }
 0x185   : > { %v802_v41 = vmul.f32 1.442695, %v782_v38  ;;  %v2365_v54 = vpop.eup %1737 }
 0x186   : > { %v804_v2 = vmul.f32 1.442695, %v783_v39  ;;  %v738_v37 = vpop.f32.mrf.mxu2  ;;  %v2368_v57 = vpop.eup %1739  ;;  %v828_v43 = vadd.f32 1.0, %v2365_v54  ;;  %v831_v32 = vmul.f32 -0.5, %v2365_v54  ;;  %v834_v34 = vand.u32 2147483647, %v2365_v54 }
 0x187   : > { %1741 = vpow2.f32 %v802_v41  ;;  %v2352_v42 = vadd.f32 %v738_v37, %v697_v5  ;;  %v767_v44 = vpop.f32.mrf.mxu3  ;;  %v837_v46 = vadd.f32 1.0, %v2368_v57  ;;  %v840_v53 = vmul.f32 -0.5, %v2368_v57 }
 0x188   : > { %1743 = vpow2.f32 %v804_v2  ;;  %v2354_v15 = vadd.f32 %v767_v44, %v697_v5  ;;  %v832_v29 = vadd.f32 1.0, %v831_v32  ;;  %vm2399_vm3 = vcmp.lt.f32.partialorder %v834_v34, 0.0004427343  ;;  %v904_v34 = vld [vmem:[%s2781_s6 + $0x10] sm:$0xff] }
 0x189   : > { %v2357_v28 = vmul.f32 100.0, %v2352_v42  ;;  %1745 = vlog2.f32 %v810_v55  ;;  %v841_v38 = vadd.f32 1.0, %v840_v53  ;;  %v843_v39 = vand.u32 2147483647, %v2368_v57  ;;  %1613 = vmatmul.msk.f32.gmra.mxu0 %vm472_vm0, %v904_v34  ;;  %1617 = vmatmul.msk.f32.gmra.mxu1 %vm472_vm0, %v904_v34 }
 0x18a   : > { %v2362_v50 = vmul.f32 100.0, %v2354_v15  ;;  %v815_v55 = vmul.f32 %v2350_v23, %v814_v11  ;;  %v833_v23 = vmul.f32 %v2365_v54, %v832_v29 }
 0x18b   : > { %v784_v56 = vmin.f32 %v2357_v28, 20.0  ;;  %v842_v32 = vmul.f32 %v2368_v57, %v841_v38  ;;  %vm2433_vm10 = vcmp.lt.f32.partialorder %v843_v39, 0.0004427343  ;;  %vm792_vm11 = vcmp.gt.f32.partialorder %v2357_v28, 20.0  ;;  %v905_v28 = vld [vmem:[%s2781_s6 + $0x18] sm:$0xff] }
 0x18c   : > { %v785_v58 = vmin.f32 %v2362_v50, 20.0  ;;  %vm793_vm12 = vcmp.gt.f32.partialorder %v2362_v50, 20.0 }
 0x18d   : > { %v2371_v1 = vpop.eup %1741  ;;  %v806_v52 = vmul.f32 1.442695, %v784_v56 }
 0x18e   : > { %v2377_v0 = vpop.eup %1743  ;;  %v808_v45 = vmul.f32 1.442695, %v785_v58  ;;  %v846_v60 = vadd.f32 1.0, %v2371_v1  ;;  %v849_v51 = vmul.f32 -0.5, %v2371_v1  ;;  %v852_v2 = vand.u32 2147483647, %v2371_v1 }
 0x18f   : > { %1747 = vpow2.f32 %v806_v52  ;;  %v855_v40 = vadd.f32 1.0, %v2377_v0  ;;  %v1746_v30 = vpop.eup %1745  ;;  %v858_v9 = vmul.f32 -0.5, %v2377_v0  ;;  %v861_v3 = vand.u32 2147483647, %v2377_v0 }
 0x190   : > { %1749 = vpow2.f32 %v808_v45  ;;  %v850_v13 = vadd.f32 1.0, %v849_v51  ;;  %v812_v44 = vmul.f32 0.6931472, %v1746_v30  ;;  %v824_v45 = vmul.f32 %v2359_v47, %v823_v25 }
 0x191   : > { %1751 = vlog2.f32 %v819_v61  ;;  %v859_v37 = vadd.f32 1.0, %v858_v9  ;;  %vm2422_vm6 = vcmp.lt.f32.partialorder %v852_v2, 0.0004427343  ;;  %vm862_vm7 = vcmp.lt.f32.partialorder %v861_v3, 0.0004427343  ;;  %1614 = vmatmul.msk.f32.gmra.mxu0 %vm472_vm0, %v905_v28  ;;  %1618 = vmatmul.msk.f32.gmra.mxu1 %vm472_vm0, %v905_v28 }
 0x192   : > { %1753 = vlog2.f32 %v846_v60  ;;  %v851_v33 = vmul.f32 %v2371_v1, %v850_v13  ;;  %v818_v29 = vsel %vm2406_vm4, %v815_v55, %v812_v44  ;;  %vm787_vm4 = vcmp.gt.f32.partialorder %v2324_v16, 20.0  ;;  %v964_v16 = vpop.f32.mrf.mxu1 }
 0x193   : > { %1755 = vlog2.f32 %v855_v40  ;;  %v860_v53 = vmul.f32 %v2377_v0, %v859_v37 }
 0x194   : > { %1757 = vlog2.f32 %v828_v43 }
 0x195   : > { %v1748_v49 = vpop.eup %1747  ;;  %1759 = vlog2.f32 %v837_v46 }
 0x196   : > { %v1750_v63 = vpop.eup %1749  ;;  %v864_v5 = vadd.f32 1.0, %v1748_v49  ;;  %v867_v22 = vmul.f32 -0.5, %v1748_v49  ;;  %v870_v40 = vand.u32 2147483647, %v1748_v49 }
 0x197   : > { %v1752_v18 = vpop.eup %1751  ;;  %v873_v24 = vadd.f32 1.0, %v1750_v63  ;;  %v876_v27 = vmul.f32 -0.5, %v1750_v63  ;;  %v879_v48 = vand.u32 2147483647, %v1750_v63 }
 0x198   : > { %v1754_v26 = vpop.eup %1753  ;;  %1761 = vlog2.f32 %v864_v5  ;;  %v868_v52 = vadd.f32 1.0, %v867_v22  ;;  %v821_v5 = vmul.f32 0.6931472, %v1752_v18  ;;  %vm871_vm8 = vcmp.lt.f32.partialorder %v870_v40, 0.0004427343 }
 0x199   : > { %v1756_v35 = vpop.eup %1755  ;;  %1763 = vlog2.f32 %v873_v24  ;;  %v848_v61 = vmul.f32 0.6931472, %v1754_v26  ;;  %v877_v43 = vadd.f32 1.0, %v876_v27  ;;  %vm880_vm9 = vcmp.lt.f32.partialorder %v879_v48, 0.0004427343 }
 0x19a   : > { %v1758_v41 = vpop.eup %1757  ;;  %v857_v46 = vmul.f32 0.6931472, %v1756_v35  ;;  %v869_v57 = vmul.f32 %v1748_v49, %v868_v52  ;;  %v827_v13 = vsel %vm2412_vm5, %v824_v45, %v821_v5 }
 0x19b   : > { %v1760_v58 = vpop.eup %1759  ;;  %v830_v30 = vmul.f32 0.6931472, %v1758_v41  ;;  %v854_v9 = vsel %vm2422_vm6, %v851_v33, %v848_v61  ;;  %v878_v14 = vmul.f32 %v1750_v63, %v877_v43  ;;  %v1058_v43 = vpop.permute.xlu1 %1057 }
 0x19c   : > { %v839_v62 = vmul.f32 0.6931472, %v1760_v58  ;;  %v863_v22 = vsel %vm862_vm7, %v860_v53, %v857_v46  ;;  %v886_v49 = vmul.f32 0.01, %v854_v9  ;;  %v1063_v9 = vpop.permute.xlu0 %1062 }
 0x19d   : > { %v836_v0 = vsel %vm2399_vm3, %v833_v23, %v830_v30  ;;  %v887_v63 = vmul.f32 0.01, %v863_v22  ;;  %vm786_vm3 = vcmp.gt.f32.partialorder %v2319_v8, 20.0  ;;  %v899_v8 = vld [vmem:[%s2780_s5 + $0x8] sm:$0xff] }
 0x19e   : > { %v1762_v47 = vpop.eup %1761  ;;  %v845_v26 = vsel %vm2433_vm10, %v842_v32, %v839_v62  ;;  %v884_v35 = vmul.f32 0.01, %v836_v0  ;;  %v894_v41 = vsel %vm790_vm13, %v2338_v20, %v886_v49 }
 0x19f   : > { %v1764_v54 = vpop.eup %1763  ;;  %v866_v1 = vmul.f32 0.6931472, %v1762_v47  ;;  %v885_v39 = vmul.f32 0.01, %v845_v26  ;;  %v895_v50 = vsel %vm791_vm14, %v2340_v31, %v887_v63 }
 0x1a0   : > { %v875_v11 = vmul.f32 0.6931472, %v1764_v54  ;;  %v892_v10 = vsel %vm788_vm15, %v2321_v12, %v884_v35  ;;  %v935_v12 = vpop.f32.mrf.mxu0 }
 0x1a1   : > { %v872_v24 = vsel %vm871_vm8, %v869_v57, %v866_v1  ;;  %v893_v20 = vsel %vm789_vm2, %v2326_v17, %v885_v39  ;;  %v1068_v17 = vpop.permute.xlu2 %1067 }
 0x1a2   : > { %v888_v25 = vmul.f32 0.01, %v872_v24  ;;  %v881_v59 = vsel %vm880_vm9, %v878_v14, %v875_v11 }
 0x1a3   : > { %v889_v27 = vmul.f32 0.01, %v881_v59 }
 0x1a4   : > { %v896_v7 = vsel %vm792_vm11, %v2352_v42, %v888_v25  ;;  %v882_v42 = vmul.f32 0.01, %v818_v29 }
 0x1a5   : > { %1000 = vmatpush.msra.mxu2 %v896_v7  ;;  %v897_v38 = vsel %vm793_vm12, %v2354_v15, %v889_v27  ;;  %v883_v15 = vmul.f32 0.01, %v827_v13 }
 0x1a6   : > { %1029 = vmatpush.msra.mxu3 %v897_v38  ;;  %v890_v19 = vsel %vm786_vm3, %v2314_v4, %v882_v42  ;;  %v900_v4 = vld [vmem:[%s2780_s5 + $0x10] sm:$0xff] }
 0x1a7   : > { %1001 = vmatpush.msra.mxu2 %v894_v41  ;;  %v891_v31 = vsel %vm787_vm4, %v2316_v6, %v883_v15  ;;  %v901_v6 = vld [vmem:[%s2780_s5 + $0x18] sm:$0xff] }
 0x1a8   : > { %1030 = vmatpush.msra.mxu3 %v895_v50 }
 0x1a9   : > { %1002 = vmatpush.msra.mxu2 %v892_v10  ;;  %v1053_v56 = vpop.permute.xlu2 %1052 }
 0x1aa   : > { %1031 = vmatpush.msra.mxu3 %v893_v20 }
 0x1ab   : > { %1003 = vmatpush.msra.mxu2 %v890_v19 }
 0x1ac   : > { %1032 = vmatpush.msra.mxu3 %v891_v31  ;;  %1619 = vmatmul.msk.f32.vlgmr.msra.gmra.mxu2 %vm699_vm1, %v898_v36 }
 0x1ad   : > { %1623 = vmatmul.msk.f32.vlgmr.msra.gmra.mxu3 %vm699_vm1, %v898_v36 }
 0x1b4   : > { %1620 = vmatmul.msk.f32.gmra.mxu2 %vm699_vm1, %v899_v8 }
 0x1b5   : > { %1624 = vmatmul.msk.f32.gmra.mxu3 %vm699_vm1, %v899_v8 }
 0x1bc   : > { %1621 = vmatmul.msk.f32.gmra.mxu2 %vm699_vm1, %v900_v4 }
 0x1bd   : > { %1625 = vmatmul.msk.f32.gmra.mxu3 %vm699_vm1, %v900_v4 }
 0x1c4   : > { %1622 = vmatmul.msk.f32.gmra.mxu2 %vm699_vm1, %v901_v6 }
 0x1c5   : > { %1626 = vmatmul.msk.f32.gmra.mxu3 %vm699_vm1, %v901_v6 }
 0x1ee   : > { %v938_v44 = vpop.f32.mrf.mxu0  ;;  %v967_v55 = vpop.f32.mrf.mxu1 }
 0x206   : > { %v941_v30 = vpop.f32.mrf.mxu0  ;;  %v970_v47 = vpop.f32.mrf.mxu1 }
 0x20e   : > { %v944_v26 = vpop.f32.mrf.mxu0  ;;  %v973_v63 = vpop.f32.mrf.mxu1 }
 0x22f   : > { %v1005_v21 = vpop.f32.mrf.mxu2 }
 0x230   : > { %v1006_v2 = vadd.f32 %v1005_v21, %v935_v12  ;;  %v1034_v37 = vpop.f32.mrf.mxu3 }
 0x231   : > { %v1035_v58 = vadd.f32 %v1034_v37, %v964_v16 }
 0x232   : > { %v2484_v52 = vadd.f32 %v1053_v56, %v1006_v2 }
 0x233   : > { %v2486_v61 = vadd.f32 %v1053_v56, %v1035_v58 }
 0x234   : > { %v2489_v45 = vmul.f32 100.0, %v2484_v52 }
 0x235   : > { %v2494_v48 = vmul.f32 100.0, %v2486_v61 }
 0x236   : > { %v1086_v32 = vmin.f32 %v2489_v45, 20.0  ;;  %vm1094_vm4 = vcmp.gt.f32.partialorder %v2489_v45, 20.0  ;;  %v1207_v45 = vld [vmem:[%s2783_s8 + $0x8] sm:$0xff] }
 0x237   : > { %v1008_v3 = vpop.f32.mrf.mxu2  ;;  %v1087_v53 = vmin.f32 %v2494_v48, 20.0 }
 0x238   : > { %v1009_v60 = vadd.f32 %v1008_v3, %v938_v44  ;;  %v1037_v40 = vpop.f32.mrf.mxu3  ;;  %v1102_v5 = vmul.f32 1.442695, %v1086_v32 }
 0x239   : > { %v1038_v46 = vadd.f32 %v1037_v40, %v967_v55  ;;  %v1104_v24 = vmul.f32 1.442695, %v1087_v53 }
 0x23a   : > { %v2491_v23 = vadd.f32 %v1058_v43, %v1009_v60  ;;  %1765 = vpow2.f32 %v1102_v5 }
 0x23b   : > { %v2496_v33 = vadd.f32 %v1058_v43, %v1038_v46  ;;  %1767 = vpow2.f32 %v1104_v24 }
 0x23c   : > { %v2500_v34 = vmul.f32 100.0, %v2491_v23 }
 0x23d   : > { %v2503_v51 = vmul.f32 100.0, %v2496_v33 }
 0x23e   : > { %v1088_v54 = vmin.f32 %v2500_v34, 20.0  ;;  %vm1096_vm2 = vcmp.gt.f32.partialorder %v2500_v34, 20.0 }
 0x23f   : > { %v1011_v62 = vpop.f32.mrf.mxu2  ;;  %v1089_v11 = vmin.f32 %v2503_v51, 20.0  ;;  %vm1097_vm3 = vcmp.gt.f32.partialorder %v2503_v51, 20.0 }
 0x240   : > { %v1012_v1 = vadd.f32 %v1011_v62, %v941_v30  ;;  %v1040_v57 = vpop.f32.mrf.mxu3  ;;  %v1106_v18 = vmul.f32 1.442695, %v1088_v54  ;;  %v2520_v41 = vpop.eup %1765 }
 0x241   : > { %v1041_v14 = vadd.f32 %v1040_v57, %v970_v47  ;;  %v1108_v59 = vmul.f32 1.442695, %v1089_v11  ;;  %v2529_v10 = vpop.eup %1767  ;;  %v1118_v36 = vadd.f32 1.0, %v2520_v41  ;;  %v1121_v56 = vmul.f32 -0.5, %v2520_v41 }
 0x242   : > { %v2508_v22 = vadd.f32 %v1063_v9, %v1012_v1  ;;  %1769 = vpow2.f32 %v1106_v18  ;;  %v1127_v16 = vadd.f32 1.0, %v2529_v10  ;;  %v1130_v58 = vmul.f32 -0.5, %v2529_v10 }
 0x243   : > { %v2510_v0 = vadd.f32 %v1063_v9, %v1041_v14  ;;  %1771 = vpow2.f32 %v1108_v59  ;;  %v1122_v62 = vadd.f32 1.0, %v1121_v56  ;;  %v1124_v5 = vand.u32 2147483647, %v2520_v41 }
 0x244   : > { %v2513_v25 = vmul.f32 100.0, %v2508_v22  ;;  %v1131_v9 = vadd.f32 1.0, %v1130_v58  ;;  %v1133_v11 = vand.u32 2147483647, %v2529_v10 }
 0x245   : > { %v2516_v49 = vmul.f32 100.0, %v2510_v0  ;;  %vm2566_vm5 = vcmp.lt.f32.partialorder %v1124_v5, 0.0004427343 }
 0x246   : > { %v1090_v27 = vmin.f32 %v2513_v25, 20.0  ;;  %vm2572_vm6 = vcmp.lt.f32.partialorder %v1133_v11, 0.0004427343  ;;  %vm1098_vm14 = vcmp.gt.f32.partialorder %v2513_v25, 20.0 }
 0x247   : > { %v1091_v29 = vmin.f32 %v2516_v49, 20.0  ;;  %v1014_v7 = vpop.f32.mrf.mxu2  ;;  %vm1099_vm15 = vcmp.gt.f32.partialorder %v2516_v49, 20.0 }
 0x248   : > { %v1110_v35 = vmul.f32 1.442695, %v1090_v27  ;;  %v1015_v13 = vadd.f32 %v1014_v7, %v944_v26  ;;  %v1043_v38 = vpop.f32.mrf.mxu3  ;;  %v2535_v19 = vpop.eup %1769 }
 0x249   : > { %v1112_v39 = vmul.f32 1.442695, %v1091_v29  ;;  %v1044_v28 = vadd.f32 %v1043_v38, %v973_v63  ;;  %v2538_v8 = vpop.eup %1771  ;;  %v1136_v44 = vadd.f32 1.0, %v2535_v19  ;;  %v1139_v60 = vmul.f32 -0.5, %v2535_v19 }
 0x24a   : > { %1773 = vpow2.f32 %v1110_v35  ;;  %v2522_v42 = vadd.f32 %v1068_v17, %v1015_v13  ;;  %v1145_v55 = vadd.f32 1.0, %v2538_v8  ;;  %v1142_v40 = vand.u32 2147483647, %v2535_v19 }
 0x24b   : > { %1775 = vpow2.f32 %v1112_v39  ;;  %v2524_v50 = vadd.f32 %v1068_v17, %v1044_v28  ;;  %v1148_v30 = vmul.f32 -0.5, %v2538_v8  ;;  %v1140_v18 = vadd.f32 1.0, %v1139_v60 }
 0x24c   : > { %v2527_v15 = vmul.f32 100.0, %v2522_v42  ;;  %1777 = vlog2.f32 %v1118_v36  ;;  %vm2559_vm0 = vcmp.lt.f32.partialorder %v1142_v40, 0.0004427343  ;;  %v1151_v29 = vand.u32 2147483647, %v2538_v8 }
 0x24d   : > { %v2532_v20 = vmul.f32 100.0, %v2524_v50  ;;  %v1149_v63 = vadd.f32 1.0, %v1148_v30  ;;  %v1123_v39 = vmul.f32 %v2520_v41, %v1122_v62  ;;  %v1141_v41 = vmul.f32 %v2535_v19, %v1140_v18 }
 0x24e   : > { %v1092_v31 = vmin.f32 %v2527_v15, 20.0  ;;  %vm2588_vm11 = vcmp.lt.f32.partialorder %v1151_v29, 0.0004427343  ;;  %vm1100_vm12 = vcmp.gt.f32.partialorder %v2527_v15, 20.0 }
 0x24f   : > { %v1093_v4 = vmin.f32 %v2532_v20, 20.0  ;;  %vm1101_vm13 = vcmp.gt.f32.partialorder %v2532_v20, 20.0 }
 0x250   : > { %v2541_v6 = vpop.eup %1773  ;;  %v1114_v12 = vmul.f32 1.442695, %v1092_v31 }
 0x251   : > { %v2544_v17 = vpop.eup %1775  ;;  %v1116_v21 = vmul.f32 1.442695, %v1093_v4  ;;  %v1154_v2 = vadd.f32 1.0, %v2541_v6  ;;  %v1157_v46 = vmul.f32 -0.5, %v2541_v6  ;;  %v1160_v35 = vand.u32 2147483647, %v2541_v6 }
 0x252   : > { %1779 = vpow2.f32 %v1114_v12  ;;  %v1163_v37 = vadd.f32 1.0, %v2544_v17  ;;  %v1778_v3 = vpop.eup %1777  ;;  %v1166_v53 = vmul.f32 -0.5, %v2544_v17  ;;  %v1169_v12 = vand.u32 2147483647, %v2544_v17 }
 0x253   : > { %1781 = vpow2.f32 %v1116_v21  ;;  %v1158_v27 = vadd.f32 1.0, %v1157_v46  ;;  %v1120_v38 = vmul.f32 0.6931472, %v1778_v3  ;;  %v1150_v3 = vmul.f32 %v2538_v8, %v1149_v63 }
 0x254   : > { %1783 = vlog2.f32 %v1127_v16  ;;  %v1167_v13 = vadd.f32 1.0, %v1166_v53  ;;  %v1132_v16 = vmul.f32 %v2529_v10, %v1131_v9  ;;  %vm2579_vm7 = vcmp.lt.f32.partialorder %v1160_v35, 0.0004427343 }
 0x255   : > { %1785 = vlog2.f32 %v1154_v2  ;;  %v1159_v56 = vmul.f32 %v2541_v6, %v1158_v27  ;;  %vm1170_vm8 = vcmp.lt.f32.partialorder %v1169_v12, 0.0004427343 }
 0x256   : > { %1787 = vlog2.f32 %v1163_v37  ;;  %v1168_v10 = vmul.f32 %v2544_v17, %v1167_v13 }
 0x257   : > { %1789 = vlog2.f32 %v1136_v44 }
 0x258   : > { %v1780_v43 = vpop.eup %1779  ;;  %1791 = vlog2.f32 %v1145_v55 }
 0x259   : > { %v1782_v32 = vpop.eup %1781  ;;  %v1172_v47 = vadd.f32 1.0, %v1780_v43  ;;  %v1175_v1 = vmul.f32 -0.5, %v1780_v43  ;;  %v1178_v2 = vand.u32 2147483647, %v1780_v43 }
 0x25a   : > { %v1784_v54 = vpop.eup %1783  ;;  %v1181_v57 = vadd.f32 1.0, %v1782_v32  ;;  %v1184_v24 = vmul.f32 -0.5, %v1782_v32  ;;  %v1187_v55 = vand.u32 2147483647, %v1782_v32 }
 0x25b   : > { %v1786_v14 = vpop.eup %1785  ;;  %1793 = vlog2.f32 %v1172_v47  ;;  %v1176_v31 = vadd.f32 1.0, %v1175_v1  ;;  %v1129_v30 = vmul.f32 0.6931472, %v1784_v54  ;;  %vm1179_vm9 = vcmp.lt.f32.partialorder %v1178_v2, 0.0004427343 }
 0x25c   : > { %v1788_v26 = vpop.eup %1787  ;;  %1795 = vlog2.f32 %v1181_v57  ;;  %v1156_v4 = vmul.f32 0.6931472, %v1786_v14  ;;  %v1185_v37 = vadd.f32 1.0, %v1184_v24  ;;  %vm1188_vm10 = vcmp.lt.f32.partialorder %v1187_v55, 0.0004427343 }
 0x25d   : > { %v1790_v7 = vpop.eup %1789  ;;  %v1165_v44 = vmul.f32 0.6931472, %v1788_v26  ;;  %v1177_v62 = vmul.f32 %v1780_v43, %v1176_v31  ;;  %v1126_v24 = vsel %vm2566_vm5, %v1123_v39, %v1120_v38  ;;  %v1135_v26 = vsel %vm2572_vm6, %v1132_v16, %v1129_v30  ;;  %v1222_v38 = vpop.permute.xlu1 %1221 }
 0x25e   : > { %v1792_v36 = vpop.eup %1791  ;;  %v1138_v58 = vmul.f32 0.6931472, %v1790_v7  ;;  %v1162_v19 = vsel %vm2579_vm7, %v1159_v56, %v1156_v4  ;;  %v1186_v5 = vmul.f32 %v1782_v32, %v1185_v37  ;;  %v1190_v29 = vmul.f32 0.01, %v1126_v24 }
 0x25f   : > { %v1147_v46 = vmul.f32 0.6931472, %v1792_v36  ;;  %v1171_v8 = vsel %vm1170_vm8, %v1168_v10, %v1165_v44  ;;  %v1194_v43 = vmul.f32 0.01, %v1162_v19  ;;  %v1191_v20 = vmul.f32 0.01, %v1135_v26 }
 0x260   : > { %v1144_v57 = vsel %vm2559_vm0, %v1141_v41, %v1138_v58  ;;  %v1195_v32 = vmul.f32 0.01, %v1171_v8  ;;  %vm1095_vm0 = vcmp.gt.f32.partialorder %v2494_v48, 20.0  ;;  %v1227_v58 = vpop.permute.xlu2 %1226 }
 0x261   : > { %v1794_v60 = vpop.eup %1793  ;;  %v1153_v11 = vsel %vm2588_vm11, %v1150_v3, %v1147_v46  ;;  %v1192_v59 = vmul.f32 0.01, %v1144_v57  ;;  %v1202_v15 = vsel %vm1098_vm14, %v2508_v22, %v1194_v43  ;;  %v1206_v22 = vld [vmem:[%s2783_s8] sm:$0xff]  ;;  %v1199_v34 = vsel %vm1095_vm0, %v2486_v61, %v1191_v20  ;;  %v1209_v61 = vld [vmem:[%s2783_s8 + $0x18] sm:$0xff] }
 0x262   : > { %v1796_v47 = vpop.eup %1795  ;;  %v1174_v53 = vmul.f32 0.6931472, %v1794_v60  ;;  %v1193_v63 = vmul.f32 0.01, %v1153_v11 }
 0x263   : > { %v1183_v6 = vmul.f32 0.6931472, %v1796_v47  ;;  %v1200_v7 = vsel %vm1096_vm2, %v2491_v23, %v1192_v59  ;;  %v1217_v23 = vpop.permute.xlu0 %1216 }
 0x264   : > { %v1180_v1 = vsel %vm1179_vm9, %v1177_v62, %v1174_v53  ;;  %v1201_v25 = vsel %vm1097_vm3, %v2496_v33, %v1193_v63 }
 0x265   : > { %v1196_v54 = vmul.f32 0.01, %v1180_v1  ;;  %v1189_v9 = vsel %vm1188_vm10, %v1186_v5, %v1183_v6 }
 0x266   : > { %v1197_v14 = vmul.f32 0.01, %v1189_v9 }
 0x267   : > { %v1204_v18 = vsel %vm1100_vm12, %v2522_v42, %v1196_v54  ;;  %v1203_v42 = vsel %vm1099_vm15, %v2510_v0, %v1195_v32  ;;  %v1198_v0 = vsel %vm1094_vm4, %v2484_v52, %v1190_v29  ;;  %v1208_v52 = vld [vmem:[%s2783_s8 + $0x10] sm:$0xff] }
 0x268   : > { %1258 = vmatpush.msra.mxu0 %v1204_v18  ;;  %v1205_v27 = vsel %vm1101_vm13, %v2524_v50, %v1197_v14 }
 0x269   : > { %1287 = vmatpush.msra.mxu1 %v1205_v27 }
 0x26a   : > { %1259 = vmatpush.msra.mxu0 %v1202_v15 }
 0x26b   : > { %1288 = vmatpush.msra.mxu1 %v1203_v42  ;;  %v1232_v1 = vpop.permute.xlu0 %1231 }
 0x26c   : > { %1260 = vmatpush.msra.mxu0 %v1200_v7 }
 0x26d   : > { %1289 = vmatpush.msra.mxu1 %v1201_v25 }
 0x26e   : > { %1261 = vmatpush.msra.mxu0 %v1198_v0 }
 0x26f   : > { %1290 = vmatpush.msra.mxu1 %v1199_v34  ;;  %1627 = vmatmul.msk.f32.vlgmr.msra.gmra.mxu0 %vm699_vm1, %v1206_v22 }
 0x270   : > { %1631 = vmatmul.msk.f32.vlgmr.msra.gmra.mxu1 %vm699_vm1, %v1206_v22 }
 0x277   : > { %1628 = vmatmul.msk.f32.gmra.mxu0 %vm699_vm1, %v1207_v45 }
 0x278   : > { %1632 = vmatmul.msk.f32.gmra.mxu1 %vm699_vm1, %v1207_v45 }
 0x27f   : > { %1629 = vmatmul.msk.f32.gmra.mxu0 %vm699_vm1, %v1208_v52 }
 0x280   : > { %1633 = vmatmul.msk.f32.gmra.mxu1 %vm699_vm1, %v1208_v52 }
 0x287   : > { %1630 = vmatmul.msk.f32.gmra.mxu0 %vm699_vm1, %v1209_v61 }
 0x288   : > { %1634 = vmatmul.msk.f32.gmra.mxu1 %vm699_vm1, %v1209_v61 }
 0x2ec   : > { %v1263_v48 = vpop.f32.mrf.mxu0 }
 0x2ed   : > { %v2634_v33 = vadd.f32 %v1263_v48, %v1217_v23  ;;  %v1292_v51 = vpop.f32.mrf.mxu1 }
 0x2ee   : > { %v2639_v50 = vadd.f32 %v1292_v51, %v1217_v23 }
 0x2ef   : > { %v2637_v49 = vmul.f32 100.0, %v2634_v33 }
 0x2f0   : > { %v2643_v13 = vmul.f32 100.0, %v2639_v50 }
 0x2f1   : > { %v1312_v35 = vmin.f32 %v2637_v49, 20.0  ;;  %vm1320_vm11 = vcmp.gt.f32.partialorder %v2637_v49, 20.0 }
 0x2f2   : > { %v1313_v12 = vmin.f32 %v2643_v13, 20.0  ;;  %vm1321_vm12 = vcmp.gt.f32.partialorder %v2643_v13, 20.0 }
 0x2f3   : > { %v1328_v28 = vmul.f32 1.442695, %v1312_v35 }
 0x2f4   : > { %v1266_v39 = vpop.f32.mrf.mxu0  ;;  %v1330_v44 = vmul.f32 1.442695, %v1313_v12 }
 0x2f5   : > { %v2645_v36 = vadd.f32 %v1266_v39, %v1222_v38  ;;  %v1295_v31 = vpop.f32.mrf.mxu1  ;;  %1797 = vpow2.f32 %v1328_v28 }
 0x2f6   : > { %v2647_v4 = vadd.f32 %v1295_v31, %v1222_v38  ;;  %v1444_v31 = vpop.permute.xlu2 %1443 }
 0x2f7   : > { %v2651_v16 = vmul.f32 100.0, %v2645_v36 }
 0x2f8   : > { %v2654_v21 = vmul.f32 100.0, %v2647_v4 }
 0x2f9   : > { %v1314_v2 = vmin.f32 %v2651_v16, 20.0  ;;  %vm1322_vm10 = vcmp.gt.f32.partialorder %v2651_v16, 20.0 }
 0x2fa   : > { %v1315_v37 = vmin.f32 %v2654_v21, 20.0  ;;  %vm1323_vm14 = vcmp.gt.f32.partialorder %v2654_v21, 20.0 }
 0x2fb   : > { %v1332_v41 = vmul.f32 1.442695, %v1314_v2  ;;  %v1798_v40 = vpop.eup %1797 }
 0x2fc   : > { %v1334_v55 = vmul.f32 1.442695, %v1315_v37  ;;  %v1269_v56 = vpop.f32.mrf.mxu0  ;;  %v1344_v47 = vadd.f32 1.0, %v1798_v40  ;;  %v1347_v14 = vmul.f32 -0.5, %v1798_v40  ;;  %v1350_v42 = vand.u32 2147483647, %v1798_v40 }
 0x2fd   : > { %1799 = vpow2.f32 %v1332_v41  ;;  %v1298_v3 = vpop.f32.mrf.mxu1  ;;  %v2658_v60 = vadd.f32 %v1269_v56, %v1227_v58 }
 0x2fe   : > { %1801 = vpow2.f32 %v1330_v44  ;;  %v2660_v10 = vadd.f32 %v1298_v3, %v1227_v58  ;;  %v1348_v15 = vadd.f32 1.0, %v1347_v14  ;;  %vm2691_vm1 = vcmp.lt.f32.partialorder %v1350_v42, 0.0004427343 }
 0x2ff   : > { %1803 = vpow2.f32 %v1334_v55  ;;  %v2663_v46 = vmul.f32 100.0, %v2658_v60  ;;  %v1449_v55 = vpop.permute.xlu0 %1448 }
 0x300   : > { %v2666_v30 = vmul.f32 100.0, %v2660_v10  ;;  %1805 = vlog2.f32 %v1344_v47  ;;  %v1349_v35 = vmul.f32 %v1798_v40, %v1348_v15 }
 0x301   : > { %v1316_v53 = vmin.f32 %v2663_v46, 20.0  ;;  %vm1324_vm13 = vcmp.gt.f32.partialorder %v2663_v46, 20.0 }
 0x302   : > { %v1317_v19 = vmin.f32 %v2666_v30, 20.0  ;;  %vm1325_vm15 = vcmp.gt.f32.partialorder %v2666_v30, 20.0 }
 0x303   : > { %v1800_v62 = vpop.eup %1799  ;;  %v1336_v6 = vmul.f32 1.442695, %v1316_v53 }
 0x304   : > { %v1272_v5 = vpop.f32.mrf.mxu0  ;;  %v2670_v8 = vpop.eup %1801  ;;  %v1362_v57 = vadd.f32 1.0, %v1800_v62  ;;  %v1338_v54 = vmul.f32 1.442695, %v1317_v19  ;;  %v1365_v59 = vmul.f32 -0.5, %v1800_v62  ;;  %v1368_v38 = vand.u32 2147483647, %v1800_v62 }
 0x305   : > { %v2672_v17 = vpop.eup %1803  ;;  %v2674_v9 = vadd.f32 %v1272_v5, %v1232_v1  ;;  %v1301_v43 = vpop.f32.mrf.mxu1  ;;  %v1353_v11 = vadd.f32 1.0, %v2670_v8  ;;  %1807 = vpow2.f32 %v1336_v6  ;;  %v1356_v20 = vmul.f32 -0.5, %v2670_v8 }
 0x306   : > { %1809 = vlog2.f32 %v1362_v57  ;;  %v1371_v32 = vadd.f32 1.0, %v2672_v17  ;;  %v2681_v18 = vadd.f32 %v1301_v43, %v1232_v1  ;;  %v1806_v26 = vpop.eup %1805  ;;  %v1359_v34 = vand.u32 2147483647, %v2670_v8 }
 0x307   : > { %1811 = vpow2.f32 %v1338_v54  ;;  %v2679_v24 = vmul.f32 100.0, %v2674_v9  ;;  %v1346_v0 = vmul.f32 0.6931472, %v1806_v26  ;;  %v1366_v45 = vadd.f32 1.0, %v1365_v59 }
 0x308   : > { %1813 = vlog2.f32 %v1353_v11  ;;  %v2685_v63 = vmul.f32 100.0, %v2681_v18  ;;  %v1374_v23 = vmul.f32 -0.5, %v2672_v17  ;;  %v1357_v41 = vadd.f32 1.0, %v1356_v20 }
 0x309   : > { %v1318_v27 = vmin.f32 %v2679_v24, 20.0  ;;  %1815 = vlog2.f32 %v1371_v32  ;;  %v1352_v44 = vsel %vm2691_vm1, %v1349_v35, %v1346_v0  ;;  %vm2697_vm5 = vcmp.lt.f32.partialorder %v1359_v34, 0.0004427343  ;;  %v1439_v34 = vpop.permute.xlu1 %1438 }
 0x30a   : > { %v1319_v25 = vmin.f32 %v2685_v63, 20.0  ;;  %v1367_v56 = vmul.f32 %v1800_v62, %v1366_v45  ;;  %v1375_v58 = vadd.f32 1.0, %v1374_v23  ;;  %vm2701_vm6 = vcmp.lt.f32.partialorder %v1368_v38, 0.0004427343 }
 0x30b   : > { %v1808_v29 = vpop.eup %1807  ;;  %v1340_v7 = vmul.f32 1.442695, %v1318_v27  ;;  %v1377_v47 = vand.u32 2147483647, %v2672_v17  ;;  %v1416_v43 = vmul.f32 0.01, %v1352_v44  ;;  %v1358_v62 = vmul.f32 %v2670_v8, %v1357_v41 }
 0x30c   : > { %v1810_v22 = vpop.eup %1809  ;;  %v1380_v52 = vadd.f32 1.0, %v1808_v29  ;;  %v1383_v48 = vmul.f32 -0.5, %v1808_v29  ;;  %v1342_v51 = vmul.f32 1.442695, %v1319_v25  ;;  %v1386_v53 = vand.u32 2147483647, %v1808_v29 }
 0x30d   : > { %v1812_v61 = vpop.eup %1811  ;;  %1817 = vpow2.f32 %v1340_v7  ;;  %v1364_v12 = vmul.f32 0.6931472, %v1810_v22  ;;  %v1376_v32 = vmul.f32 %v2672_v17, %v1375_v58  ;;  %vm2710_vm7 = vcmp.lt.f32.partialorder %v1377_v47, 0.0004427343 }
 0x30e   : > { %1819 = vlog2.f32 %v1380_v52  ;;  %v1389_v39 = vadd.f32 1.0, %v1812_v61  ;;  %v1814_v28 = vpop.eup %1813  ;;  %v1392_v2 = vmul.f32 -0.5, %v1812_v61  ;;  %v1384_v3 = vadd.f32 1.0, %v1383_v48 }
 0x30f   : > { %v1816_v37 = vpop.eup %1815  ;;  %v1355_v6 = vmul.f32 0.6931472, %v1814_v28  ;;  %v1370_v5 = vsel %vm2701_vm6, %v1367_v56, %v1364_v12  ;;  %v1395_v11 = vand.u32 2147483647, %v1812_v61  ;;  %vm1387_vm8 = vcmp.lt.f32.partialorder %v1386_v53, 0.0004427343 }
 0x310   : > { %1821 = vlog2.f32 %v1389_v39  ;;  %v1373_v1 = vmul.f32 0.6931472, %v1816_v37  ;;  %v1393_v57 = vadd.f32 1.0, %v1392_v2  ;;  %v1385_v26 = vmul.f32 %v1808_v29, %v1384_v3 }
 0x311   : > { %1823 = vpow2.f32 %v1342_v51  ;;  %v1418_v42 = vmul.f32 0.01, %v1370_v5  ;;  %v1361_v17 = vsel %vm2697_vm5, %v1358_v62, %v1355_v6  ;;  %vm2718_vm9 = vcmp.lt.f32.partialorder %v1395_v11, 0.0004427343  ;;  %v1454_v30 = vpop.permute.xlu1 %1453 }
 0x312   : > { %v1379_v25 = vsel %vm2710_vm7, %v1376_v32, %v1373_v1  ;;  %v1394_v0 = vmul.f32 %v1812_v61, %v1393_v57  ;;  %v1417_v39 = vmul.f32 0.01, %v1361_v17  ;;  %v1424_v16 = vsel %vm1320_vm11, %v2634_v33, %v1416_v43 }
 0x313   : > { %v1818_v19 = vpop.eup %1817  ;;  %v1426_v35 = vsel %vm1322_vm10, %v2645_v36, %v1418_v42  ;;  %v1419_v61 = vmul.f32 0.01, %v1379_v25  ;;  %v1456_v56 = vmul.f32 %v1439_v34, %v1424_v16  ;;  %vm1326_vm3 = vcmp.gt.f32.partialorder %v2679_v24, 20.0  ;;  %v1486_v25 = vpop.permute.xlu2 %1485 }
 0x314   : > { %v1820_v54 = vpop.eup %1819  ;;  %v1398_v14 = vadd.f32 1.0, %v1818_v19  ;;  %v1401_v27 = vmul.f32 -0.5, %v1818_v19  ;;  %v1404_v38 = vand.u32 2147483647, %v1818_v19  ;;  %v1458_v36 = vmul.f32 %v1444_v31, %v1426_v35 }
 0x315   : > { %v1382_v59 = vmul.f32 0.6931472, %v1820_v54  ;;  %v1427_v49 = vsel %vm1323_vm14, %v2647_v4, %v1419_v61  ;;  %v1425_v33 = vsel %vm1321_vm12, %v2639_v50, %v1417_v39  ;;  %vm1327_vm0 = vcmp.gt.f32.partialorder %v2685_v63, 20.0 }
 0x316   : > { %v1822_v15 = vpop.eup %1821  ;;  %1825 = vlog2.f32 %v1398_v14  ;;  %v1402_v48 = vadd.f32 1.0, %v1401_v27  ;;  %vm1405_vm2 = vcmp.lt.f32.partialorder %v1404_v38, 0.0004427343  ;;  %v1464_v47 = vadd.f32 %v1458_v36, %v1456_v56 }
 0x317   : > { %v1824_v7 = vpop.eup %1823  ;;  %v1388_v8 = vsel %vm1387_vm8, %v1385_v26, %v1382_v59  ;;  %v1391_v22 = vmul.f32 0.6931472, %v1822_v15  ;;  %v1459_v53 = vmul.f32 %v1444_v31, %v1427_v49  ;;  %v1457_v6 = vmul.f32 %v1439_v34, %v1425_v33 }
 0x318   : > { %v1420_v29 = vmul.f32 0.01, %v1388_v8  ;;  %v1407_v52 = vadd.f32 1.0, %v1824_v7  ;;  %v1410_v51 = vmul.f32 -0.5, %v1824_v7  ;;  %v1403_v44 = vmul.f32 %v1818_v19, %v1402_v48 }
 0x319   : > { %v1397_v23 = vsel %vm2718_vm9, %v1394_v0, %v1391_v22  ;;  %v1413_v46 = vand.u32 2147483647, %v1824_v7  ;;  %v1473_v43 = vadd.f32 %v1459_v53, %v1457_v6  ;;  %v1497_v0 = vlaneseq }
 0x31a   : > { %1827 = vlog2.f32 %v1407_v52  ;;  %v1428_v12 = vsel %vm1324_vm13, %v2658_v60, %v1420_v29  ;;  %v1421_v2 = vmul.f32 0.01, %v1397_v23  ;;  %v1411_v41 = vadd.f32 1.0, %v1410_v51 }
 0x31b   : > { %v1460_v21 = vmul.f32 %v1449_v55, %v1428_v12  ;;  %vm1414_vm4 = vcmp.lt.f32.partialorder %v1413_v46, 0.0004427343  ;;  %vm1494_vm1 = vcmask 1040384   ;;  %vm1499_vm5 = vcmp.lt.s32.totalorder %v1497_v0, 256 }
 0x31c   : > { %v1826_v28 = vpop.eup %1825  ;;  %v1429_v3 = vsel %vm1325_vm15, %v2660_v10, %v1421_v2  ;;  %v1412_v19 = vmul.f32 %v1824_v7, %v1411_v41 }
 0x31d   : > { %v1400_v37 = vmul.f32 0.6931472, %v1826_v28  ;;  %v1465_v1 = vadd.f32 %v1464_v47, %v1460_v21  ;;  %v1461_v13 = vmul.f32 %v1449_v55, %v1429_v3 }
 0x31f   : > { %v1406_v58 = vsel %vm1405_vm2, %v1403_v44, %v1400_v37  ;;  %v1474_v62 = vadd.f32 %v1473_v43, %v1461_v13 }
 0x320   : > { %v1828_v60 = vpop.eup %1827  ;;  %v1422_v40 = vmul.f32 0.01, %v1406_v58 }
 0x321   : > { %v1409_v4 = vmul.f32 0.6931472, %v1828_v60 }
 0x322   : > { %v1430_v5 = vsel %vm1326_vm3, %v2674_v9, %v1422_v40 }
 0x323   : > { %v1462_v50 = vmul.f32 %v1454_v30, %v1430_v5  ;;  %v1415_v57 = vsel %vm1414_vm4, %v1412_v19, %v1409_v4 }
 0x324   : > { %v1423_v54 = vmul.f32 0.01, %v1415_v57 }
 0x325   : > { %v1466_v10 = vadd.f32 %v1465_v1, %v1462_v50 }
 0x326   : > { %v1431_v24 = vsel %vm1327_vm0, %v2681_v18, %v1423_v54  ;;  %v1488_v18 = vperm.slane %v1486_v25, 0 }
 0x327   : > { %v1467_v11 = vrot.slane %v1466_v10, 4  ;;  %v1463_v14 = vmul.f32 %v1454_v30, %v1431_v24 }
 0x329   : > { %v1468_v32 = vadd.f32 %v1467_v11, %v1466_v10  ;;  %v1475_v59 = vadd.f32 %v1474_v62, %v1463_v14 }
 0x32b   : > { %v1469_v9 = vrot.slane %v1468_v32, 2  ;;  %v1476_v26 = vrot.slane %v1475_v59, 4 }
 0x32d   : > { %v1470_v27 = vadd.f32 %v1469_v9, %v1468_v32  ;;  %v1477_v15 = vadd.f32 %v1476_v26, %v1475_v59 }
 0x32f   : > { %v1478_v42 = vrot.slane %v1477_v15, 2  ;;  %v1471_v20 = vrot.slane %v1470_v27, 1 }
 0x331   : > { %v1479_v7 = vadd.f32 %v1478_v42, %v1477_v15  ;;  %v1472_v63 = vadd.f32 %v1471_v20, %v1470_v27 }
 0x333   : > { %v1480_v8 = vrot.slane %v1479_v7, 1  ;;  %v1489_v17 = vadd.f32 %v1488_v18, %v1472_v63 }
 0x335   : > { %v1481_v22 = vadd.f32 %v1480_v8, %v1479_v7 }
 0x337   : > { %v1490_v34 = vadd.f32 %v1488_v18, %v1481_v22 }
 0x339   : > { %v1493_v29 = vrot.slane %v1490_v34, 7 }
 0x33b   : > { %v1495_v45 = vsel %vm1494_vm1, %v1489_v17, %v1493_v29 }
 0x33c   : > { %1501 = vst.msk [vmem:[%s435_s13] sm:$0x3] %vm1499_vm5, %v1495_v45 }
 0x33d   : > { %1886 = shalt.err (!%p1883_p4)
}
 0x33e   : > { %1650 = dma.vmem_to_hbm [thread:$0]  (%p2044_p10), %s1516_s29, 32, %s1518_s27, %s1503_s11  }
 0x33f PF: > { %s2844_s23 = sld [smem:[#allocation9_spill]]  ;;  %p1661_p5 = scmp.ge.s32.totalorder %s1925_s26, 2 }
 0x341   : > { %p1657_p7 = pnand %p1661_p5, %p2048_p11 }
 0x343   : > { %p1658_p8 = pneg %p1657_p7 }
 0x345   : > { %s1529_s16 = sand.u32 1, %s2844_s23  }
 0x346   : > { %s1530_s18 = scalar_lea.sflag [#allocation5], %s1529_s16 }
 0x347   : > { %1908 = dma.done.wait (%p1658_p8), %s1530_s18, 32  }
 0x348   : > { %1910 = vsyncadd (%p1658_p8), %s1530_s18, 4294967264  ;;  %s2846_s26 = sld [smem:[#allocation11_spill]]  ;;  %s2849_s23 = smov %s1917_s24 }
 0x349   : > { %s2847_s28 = sld [smem:[#allocation10_spill]] }
 0x34a   : > { %s2848_s25 = sld [smem:[#allocation12_spill]] }
 0x34e   : > { %p27_p9 = scmp.ge.s32.totalorder %s2846_s26, 5  }
 0x34f   : > { %s2850_s24 = smov %s2847_s28 }
 0x350   :  { %29 = sbr.rel (!%p27_p9) target bundleno = 8 (0x8), region = 113 }
 0x355   :  { %1536 = vsyncpa [#allocation4], 1 }
 0x356   :  { %1538 = vsyncpa [#allocation4 + $0x1], 1 }
 0x357   :  { %1539 = vsyncpa [#allocation5], 1 }
 0x358   :  { %1541 = vsyncpa [#allocation5 + $0x1], 1 }

</bundles_post_ra>
